<compile_context>
chip_gen: v5e
topology: v5e:2x2
jax: 0.10.0
libtpu: 0.0.40
codegen_flags: <defaults>
</compile_context>

<pallas_src>
import functools

import numpy as np
import jax
import jax.numpy as jnp
from jax.experimental import pallas as pl
from jax.experimental.pallas import tpu as pltpu


def _round_up(x, m):
    return (x + m - 1) // m * m


# ----------------------------------------------------------------------------
# Generation-aware scoped-VMEM budget (re-derived per trace; v7x has 64 MiB/TC).
# ----------------------------------------------------------------------------
def _vmem_limit_bytes():
    cap = None
    try:
        cap = int(pltpu.get_tpu_info().vmem_capacity_bytes)
    except Exception:
        cap = None
    if cap is None:
        kind = ""
        try:
            kind = jax.devices()[0].device_kind.lower()
        except Exception:
            pass
        # v5e / v6e have 128 MiB per TensorCore; assume 64 MiB (v7x) otherwise.
        cap = 128 * 1024 * 1024 if ("v5" in kind or "v6" in kind) else 64 * 1024 * 1024
    return min(int(cap * 3 // 4), 100 * 1024 * 1024)


def _fc_tile_n():
    # Bigger FC weight tiles on 128-MiB parts (v5e/v6e); stay at 1024 on v7x.
    return 2048 if _vmem_limit_bytes() >= 80 * 1024 * 1024 else 1024


# ----------------------------------------------------------------------------
# Generic Pallas GEMM + bias (+ optional ReLU): out = relu(x @ w + b)
# bf16 operands, fp32 accumulation.  Grid = (N_tiles, K_tiles); K (reduction) last.
# ----------------------------------------------------------------------------
def _matmul_kernel(x_ref, w_ref, b_ref, o_ref, acc_ref, *, relu):
    k = pl.program_id(1)

    @pl.when(k == 0)
    def _():
        acc_ref[...] = jnp.zeros_like(acc_ref)

    acc_ref[...] += jnp.dot(x_ref[...], w_ref[...],
                            preferred_element_type=jnp.float32)

    @pl.when(k == pl.num_programs(1) - 1)
    def _():
        out = acc_ref[...] + b_ref[...]
        if relu:
            out = jnp.maximum(out, 0.0)
        o_ref[...] = out.astype(o_ref.dtype)


def _matmul_kernel_single_k(x_ref, w_ref, b_ref, o_ref, *, relu):
    # Single K step: no scratch accumulator needed.
    out = jnp.dot(x_ref[...], w_ref[...],
                  preferred_element_type=jnp.float32) + b_ref[...]
    if relu:
        out = jnp.maximum(out, 0.0)
    o_ref[...] = out.astype(o_ref.dtype)


def matmul_bias(x, w, b, *, relu=False, tn=None, tk=None, out_dtype=jnp.float32):
    """x: (M, K), w: (K, N), b: (N,) -> (M, N) out_dtype.  bf16 inputs, fp32 acc."""
    M, K = x.shape
    K2, N = w.shape
    assert K == K2
    tn = N if tn is None else tn
    tk = K if tk is None else tk
    assert N % tn == 0 and K % tk == 0
    nk = K // tk
    grid = (N // tn, nk)
    b2 = b.reshape(1, N).astype(jnp.float32)
    x = x.astype(jnp.bfloat16)
    w = w.astype(jnp.bfloat16)

    if nk == 1:
        kernel = functools.partial(_matmul_kernel_single_k, relu=relu)
        scratch = []
    else:
        kernel = functools.partial(_matmul_kernel, relu=relu)
        scratch = [pltpu.VMEM((M, tn), jnp.float32)]

    return pl.pallas_call(
        kernel,
        out_shape=jax.ShapeDtypeStruct((M, N), out_dtype),
        grid_spec=pltpu.PrefetchScalarGridSpec(
            num_scalar_prefetch=0,
            grid=grid,
            in_specs=[
                pl.BlockSpec((M, tk), lambda j, k: (0, k)),
                pl.BlockSpec((tk, tn), lambda j, k: (k, j)),
                pl.BlockSpec((1, tn), lambda j, k: (0, j)),
            ],
            out_specs=pl.BlockSpec((M, tn), lambda j, k: (0, j)),
            scratch_shapes=scratch,
        ),
        compiler_params=pltpu.CompilerParams(
            dimension_semantics=("parallel", "arbitrary"),
            vmem_limit_bytes=_vmem_limit_bytes(),
        ),
    )(x, w, b2)


# ----------------------------------------------------------------------------
# Conv2d(k=3, padding=1) + bias + ReLU (+ optional fused MaxPool2d(2,2)).
#
# The input is a zero-padded, row-flattened image of shape ((H+3)*P, Cin) with row
# stride P = round_up(W+2, 8): row 0 = top pad, rows 1..H = data (col 0 left pad,
# cols 1..W data, cols W+1..P-1 right pad), rows H+1..H+2 = bottom pad.  Tap (kh, kw)
# is then a contiguous row-chunk at offset kh*P + kw and the nine taps accumulate as
# row-shifted GEMMs into an fp32 scratch of shape (H*P, Cout-tile).
#   pool=False: the epilogue writes the next conv's padded buffer directly
#               (interior at flattened offset P+1, junk columns zeroed -> borders).
#   pool=True : the 2x2 max is done on the accumulator, then bias+ReLU, and the
#               pooled (H/2, W/2) activation is stored as plain NHWC.
# ----------------------------------------------------------------------------
def _conv3x3_kernel(x_ref, w_ref, b_ref, o_ref, acc_ref, *, H, W, P, pool):
    HP = H * P
    tc = o_ref.shape[-1]

    # Nine taps as row-shifted GEMMs; tap (0,0) assigns (no zero-init pass).
    acc_ref[...] = jnp.dot(x_ref[0, 0:HP, :], w_ref[0],
                           preferred_element_type=jnp.float32)
    for idx in range(1, 9):
        kh, kw = divmod(idx, 3)
        off = kh * P + kw
        acc_ref[...] += jnp.dot(x_ref[0, off:off + HP, :], w_ref[idx],
                                preferred_element_type=jnp.float32)

    bias = b_ref[...]  # (1, tc) f32

    if not pool:
        # Vectorized epilogue: bias + ReLU over the whole plane, zero the junk
        # columns (in-row positions >= W), and store straight into the interior of
        # the next layer's padded buffer (flattened offset P+1); pad regions get 0.
        y = jnp.maximum(acc_ref[...] + bias, 0.0)
        col = jax.lax.broadcasted_iota(jnp.int32, (HP, 1), 0) % P
        y = jnp.where(col < W, y, 0.0).astype(o_ref.dtype)
        Lp = (H + 3) * P
        o_ref[0, P + 1:P + 1 + HP, :] = y
        o_ref[0, 0:P + 1, :] = jnp.zeros((P + 1, tc), o_ref.dtype)
        o_ref[0, P + 1 + HP:Lp, :] = jnp.zeros((Lp - (P + 1 + HP), tc), o_ref.dtype)
    else:
        # Fused MaxPool2d(2,2): row-pair max via aligned half-slices, column-pair max
        # via stride-2 sublane loads; bias + ReLU commute with max so they run after.
        Ho, Wo = H // 2, W // 2
        a = acc_ref[...].reshape(Ho, 2 * P, tc)
        hm = jnp.maximum(a[:, :P, :], a[:, P:, :]).reshape(Ho * P, tc)
        acc_ref[0:Ho * P, :] = hm                                # reuse scratch
        ev = acc_ref[pl.ds(0, Ho * (P // 2), stride=2), :]       # columns 0,2,4,...
        od = acc_ref[pl.ds(1, Ho * (P // 2), stride=2), :]       # columns 1,3,5,...
        y = jnp.maximum(jnp.maximum(ev, od) + bias, 0.0)
        pv = y.reshape(Ho, P // 2, tc)
        o_ref[0] = pv[:, :Wo, :].astype(o_ref.dtype)


def conv3x3_relu(x_flat, w9, b, *, H, W, P, pool):
    """x_flat: (N, (H+3)*P, Cin) bf16 padded-flat; w9: (9, Cin, Cout); b: (Cout,)."""
    N, Lp, Cin = x_flat.shape
    assert Lp == (H + 3) * P and P >= W + 2 and P % 8 == 0
    Cout = w9.shape[-1]
    tc = min(Cout, 128)
    assert Cout % tc == 0
    grid = (N, Cout // tc)
    b2 = b.reshape(1, Cout).astype(jnp.float32)

    if pool:
        assert H % 2 == 0 and W % 2 == 0
        Ho, Wo = H // 2, W // 2
        out_shape = jax.ShapeDtypeStruct((N, Ho, Wo, Cout), jnp.bfloat16)
        out_spec = pl.BlockSpec((1, Ho, Wo, tc), lambda n, j: (n, 0, 0, j))
    else:
        out_shape = jax.ShapeDtypeStruct((N, Lp, Cout), jnp.bfloat16)
        out_spec = pl.BlockSpec((1, Lp, tc), lambda n, j: (n, 0, j))

    return pl.pallas_call(
        functools.partial(_conv3x3_kernel, H=H, W=W, P=P, pool=pool),
        out_shape=out_shape,
        grid_spec=pltpu.PrefetchScalarGridSpec(
            num_scalar_prefetch=0,
            grid=grid,
            in_specs=[
                pl.BlockSpec((1, Lp, Cin), lambda n, j: (n, 0, 0)),
                pl.BlockSpec((9, Cin, tc), lambda n, j: (0, 0, j)),
                pl.BlockSpec((1, tc), lambda n, j: (0, j)),
            ],
            out_specs=out_spec,
            scratch_shapes=[pltpu.VMEM((H * P, tc), jnp.float32)],
        ),
        compiler_params=pltpu.CompilerParams(
            dimension_semantics=("parallel", "parallel"),
            vmem_limit_bytes=_vmem_limit_bytes(),
        ),
    )(x_flat, w9.astype(jnp.bfloat16), b2)


def pad_to_flat(x_nhwc, P):
    """(N,H,W,C) -> zero-padded, row-flattened (N,(H+3)*P,C) with row stride P."""
    N, H, W, C = x_nhwc.shape
    xp = jnp.pad(x_nhwc.astype(jnp.bfloat16),
                 ((0, 0), (1, 2), (1, P - 1 - W), (0, 0)))
    return xp.reshape(N, (H + 3) * P, C)


def flat_to_nhwc(xf, H, W, P):
    """Inverse of pad_to_flat (test helper)."""
    N, _, C = xf.shape
    return xf.reshape(N, H + 3, P, C)[:, 1:1 + H, 1:1 + W, :]


# ----------------------------------------------------------------------------
# AdaptiveAvgPool2d((7,7)) general path (negligible glue compute; plain JAX).
# ----------------------------------------------------------------------------
def _pool_matrix(in_size, out_size):
    m = np.zeros((out_size, in_size), np.float32)
    for i in range(out_size):
        s = (i * in_size) // out_size
        e = -(-((i + 1) * in_size) // out_size)  # ceil
        m[i, s:e] = 1.0 / (e - s)
    return jnp.asarray(m)


def adaptive_avgpool_7x7(x):
    N, H, W, C = x.shape
    if H == 7 and W == 7:
        return x
    Ph = _pool_matrix(H, 7)
    Pw = _pool_matrix(W, 7)
    y = jnp.einsum("ih,jw,nhwc->nijc", Ph, Pw, x.astype(jnp.float32))
    return y.astype(x.dtype)


# ----------------------------------------------------------------------------
# VGG16 ('D') parameters & forward
# ----------------------------------------------------------------------------
VGG16_BLOCKS = [(64, 2), (128, 2), (256, 3), (512, 3), (512, 3)]


def init_params(key, num_classes=10):
    params = {"convs": [], "fcs": []}
    cin = 3
    for cout, reps in VGG16_BLOCKS:
        for _ in range(reps):
            key, k1, k2 = jax.random.split(key, 3)
            fan_in = 9 * cin
            w = (jax.random.normal(k1, (9, cin, cout), jnp.float32)
                 * np.sqrt(2.0 / fan_in)).astype(jnp.bfloat16)
            b = jax.random.normal(k2, (cout,), jnp.float32) * 0.01
            params["convs"].append((w, b))
            cin = cout
    dims = [512 * 7 * 7, 4096, 4096, num_classes]
    for i in range(3):
        key, k1, k2 = jax.random.split(key, 3)
        w = (jax.random.normal(k1, (dims[i], dims[i + 1]), jnp.float32)
             * np.sqrt(2.0 / dims[i])).astype(jnp.bfloat16)
        b = jax.random.normal(k2, (dims[i + 1],), jnp.float32) * 0.01
        params["fcs"].append((w, b))
    return params


def prepare_params(params):
    """One-time (outside jit) fold of fc1 for the 1x1-pre-avgpool fast path.

    For a 1x1 feature map, AdaptiveAvgPool2d((7,7)) replicates each channel to all
    49 positions, so x_flat @ W1 == feat @ sum_over_49_rows(W1) exactly.
    """
    w1, b1 = params["fcs"][0]
    w1f = (w1.astype(jnp.float32).reshape(512, 49, -1).sum(axis=1)
           .astype(jnp.bfloat16))
    params = dict(params)
    params["fc1_folded"] = (w1f, b1)
    return params


def vgg_forward(params, x_nchw):
    # NCHW (PyTorch) -> NHWC bf16 for the TPU kernels.
    x = jnp.transpose(x_nchw, (0, 2, 3, 1)).astype(jnp.bfloat16)
    ci = 0
    for _, reps in VGG16_BLOCKS:
        N, H, W, _ = x.shape
        assert H % 2 == 0 and W % 2 == 0, "spatial dims must stay even per block"
        P = _round_up(W + 2, 8)
        xf = pad_to_flat(x, P)          # only one small pad per block (post-pool act)
        for r in range(reps):
            w, b = params["convs"][ci]
            ci += 1
            pool = (r == reps - 1)
            out = conv3x3_relu(xf, w, b, H=H, W=W, P=P, pool=pool)
            if pool:
                x = out                 # (N, H/2, W/2, Cout) NHWC
            else:
                xf = out                # padded-flat, feeds next conv directly

    N, H, W, C = x.shape
    if H == 1 and W == 1 and "fc1_folded" in params:
        # CIFAR-sized fast path: avgpool would just replicate; use folded fc1 weight.
        feat = x.reshape(N, C)
        w1f, b1 = params["fc1_folded"]
        h = matmul_bias(feat, w1f, b1, relu=True, tn=1024, tk=C,
                        out_dtype=jnp.bfloat16)
    else:
        xa = adaptive_avgpool_7x7(x)                                  # (N,7,7,512)
        xa = jnp.transpose(xa, (0, 3, 1, 2)).reshape(N, -1)           # torch.flatten order
        w1, b1 = params["fcs"][0]
        h = matmul_bias(xa, w1, b1, relu=True, tn=1024, tk=3584,
                        out_dtype=jnp.bfloat16)
    # TODO(synk): nn.Dropout has no Pallas equivalent; modeled as identity (eval mode).
    w2, b2 = params["fcs"][1]
    h = matmul_bias(h, w2, b2, relu=True, tn=_fc_tile_n(), tk=2048,
                    out_dtype=jnp.bfloat16)
    w3, b3 = params["fcs"][2]
    return matmul_bias(h, w3, b3, relu=False, out_dtype=jnp.float32)


# ----------------------------------------------------------------------------
# References for the self-check (fp32, same bf16-quantized inputs).
# ----------------------------------------------------------------------------
def _ref_conv_relu(x, w9, b):
    w = w9.astype(jnp.float32).reshape(3, 3, w9.shape[1], w9.shape[2])
    y = jax.lax.conv_general_dilated(
        x.astype(jnp.float32), w, window_strides=(1, 1), padding="SAME",
        dimension_numbers=("NHWC", "HWIO", "NHWC"),
        precision=jax.lax.Precision.HIGHEST)
    return jnp.maximum(y + b.reshape(1, 1, 1, -1), 0.0)


def _ref_maxpool2x2(x):
    return jax.lax.reduce_window(x, -jnp.inf, jax.lax.max,
                                 (1, 2, 2, 1), (1, 2, 2, 1), "VALID")


if __name__ == "__main__":
    key = jax.random.PRNGKey(0)
    k_params, k_x, k_t = jax.random.split(key, 3)
    num_classes = 10

    # --- conv kernel self-checks on tiny shapes --------------------------------
    kx, kw1, kb1, kw2, kb2 = jax.random.split(k_t, 5)
    H = W = 8
    Cin, Cmid, Cout = 8, 16, 32
    xt = jax.random.normal(kx, (2, H, W, Cin), jnp.float32).astype(jnp.bfloat16)
    w1 = (jax.random.normal(kw1, (9, Cin, Cmid), jnp.float32) * 0.15).astype(jnp.bfloat16)
    b1 = jnp.linspace(-0.2, 0.2, Cmid, dtype=jnp.float32)
    w2 = (jax.random.normal(kw2, (9, Cmid, Cout), jnp.float32) * 0.1).astype(jnp.bfloat16)
    b2 = jnp.linspace(-0.1, 0.1, Cout, dtype=jnp.float32)

    P = _round_up(W + 2, 8)
    xf = pad_to_flat(xt, P)

    # (a) single conv, padded-flat output layout
    y1_flat = jax.block_until_ready(conv3x3_relu(xf, w1, b1, H=H, W=W, P=P, pool=False))
    y1 = flat_to_nhwc(y1_flat, H, W, P).astype(jnp.float32)
    ref1 = _ref_conv_relu(xt, w1, b1)
    np.testing.assert_allclose(np.asarray(y1), np.asarray(ref1), atol=6e-2, rtol=6e-2)

    # (b) chained conv (consumes padded-flat output) with fused 2x2 maxpool
    y2 = jax.block_until_ready(conv3x3_relu(y1_flat, w2, b2, H=H, W=W, P=P, pool=True))
    ref2 = _ref_maxpool2x2(_ref_conv_relu(ref1, w2, b2))
    np.testing.assert_allclose(np.asarray(y2, dtype=np.float32), np.asarray(ref2),
                               atol=6e-2, rtol=6e-2)

    # --- full VGG16 forward -----------------------------------------------------
    params = prepare_params(init_params(k_params, num_classes=num_classes))
    # NCHW input consistent with the module (3 input channels, spatial 32).
    x = jax.random.normal(k_x, (2, 3, 32, 32), jnp.float32)

    fwd = jax.jit(vgg_forward)
    out = jax.block_until_ready(fwd(params, x))
    assert out.shape == (2, num_classes), out.shape
    assert bool(jnp.all(jnp.isfinite(out)))
    print("KERNEL_OK")
</pallas_src>

<mosaic_0001>
module attributes {stable_mosaic.version = 11 : i64} {
  func.func @_conv3x3_kernel(%arg0: i32, %arg1: i32, %arg2: memref<1x176x8xbf16, #tpu.memory_space<vmem>>, %arg3: memref<9x8x16xbf16, #tpu.memory_space<vmem>>, %arg4: memref<1x16xf32, #tpu.memory_space<vmem>>, %arg5: memref<1x176x16xbf16, #tpu.memory_space<vmem>>, %arg6: memref<128x16xf32, #tpu.memory_space<vmem>>) attributes {dimension_semantics = [#tpu.dimension_semantics<parallel>, #tpu.dimension_semantics<parallel>], iteration_bounds = array<i64: 2, 1>, scalar_prefetch = 0 : i64, scratch_operands = 1 : i64, tpu.core_type = #tpu.core_type<tc>, window_params = [{transform_indices = @transform_0, window_bounds = array<i64: 1, 176, 8>}, {transform_indices = @transform_1, window_bounds = array<i64: 9, 8, 16>}, {transform_indices = @transform_2, window_bounds = array<i64: 1, 16>}, {transform_indices = @transform_3, window_bounds = array<i64: 1, 176, 16>}]} {
    %c0 = arith.constant 0 : index
    %c0_0 = arith.constant 0 : index
    %c0_1 = arith.constant 0 : index
    %0 = vector.load %arg2[%c0, %c0_0, %c0_1] : memref<1x176x8xbf16, #tpu.memory_space<vmem>>, vector<1x128x8xbf16>
    %1 = vector.shape_cast %0 : vector<1x128x8xbf16> to vector<128x8xbf16>
    %c0_2 = arith.constant 0 : index
    %c0_3 = arith.constant 0 : index
    %c0_4 = arith.constant 0 : index
    %2 = vector.load %arg3[%c0_2, %c0_3, %c0_4] : memref<9x8x16xbf16, #tpu.memory_space<vmem>>, vector<1x8x16xbf16>
    %3 = vector.shape_cast %2 : vector<1x8x16xbf16> to vector<8x16xbf16>
    %cst = arith.constant dense<0.000000e+00> : vector<128x16xf32>
    %4 = tpu.matmul %1, %3, %cst {dimension_numbers = #tpu.dot_dimension_numbers<[1], [0], [0], [1], [0, 0, 1, 1], [], []>} : vector<128x8xbf16>, vector<8x16xbf16>, vector<128x16xf32> -> vector<128x16xf32>
    %c0_5 = arith.constant 0 : index
    %c0_6 = arith.constant 0 : index
    %5 = vector.load %arg6[%c0_5, %c0_6] : memref<128x16xf32, #tpu.memory_space<vmem>>, vector<128x16xf32>
    tpu.vector_store %arg6[%c0_5, %c0_6], %4 {strides = array<i32>} : memref<128x16xf32, #tpu.memory_space<vmem>>, vector<128x16xf32>,
    %c0_7 = arith.constant 0 : index
    %c0_8 = arith.constant 0 : index
    %6 = vector.load %arg6[%c0_7, %c0_8] : memref<128x16xf32, #tpu.memory_space<vmem>>, vector<128x16xf32>
    %c0_9 = arith.constant 0 : index
    %c1 = arith.constant 1 : index
    %c0_10 = arith.constant 0 : index
    %7 = vector.load %arg2[%c0_9, %c1, %c0_10] : memref<1x176x8xbf16, #tpu.memory_space<vmem>>, vector<1x128x8xbf16>
    %8 = vector.shape_cast %7 : vector<1x128x8xbf16> to vector<128x8xbf16>
    %c1_11 = arith.constant 1 : index
    %c0_12 = arith.constant 0 : index
    %c0_13 = arith.constant 0 : index
    %9 = vector.load %arg3[%c1_11, %c0_12, %c0_13] : memref<9x8x16xbf16, #tpu.memory_space<vmem>>, vector<1x8x16xbf16>
    %10 = vector.shape_cast %9 : vector<1x8x16xbf16> to vector<8x16xbf16>
    %cst_14 = arith.constant dense<0.000000e+00> : vector<128x16xf32>
    %11 = tpu.matmul %8, %10, %cst_14 {dimension_numbers = #tpu.dot_dimension_numbers<[1], [0], [0], [1], [0, 0, 1, 1], [], []>} : vector<128x8xbf16>, vector<8x16xbf16>, vector<128x16xf32> -> vector<128x16xf32>
    %12 = arith.addf %6, %11 : vector<128x16xf32>
    %c0_15 = arith.constant 0 : index
    %c0_16 = arith.constant 0 : index
    %13 = vector.load %arg6[%c0_15, %c0_16] : memref<128x16xf32, #tpu.memory_space<vmem>>, vector<128x16xf32>
    tpu.vector_store %arg6[%c0_15, %c0_16], %12 {strides = array<i32>} : memref<128x16xf32, #tpu.memory_space<vmem>>, vector<128x16xf32>,
    %c0_17 = arith.constant 0 : index
    %c0_18 = arith.constant 0 : index
    %14 = vector.load %arg6[%c0_17, %c0_18] : memref<128x16xf32, #tpu.memory_space<vmem>>, vector<128x16xf32>
    %c0_19 = arith.constant 0 : index
    %c2 = arith.constant 2 : index
    %c0_20 = arith.constant 0 : index
    %15 = vector.load %arg2[%c0_19, %c2, %c0_20] : memref<1x176x8xbf16, #tpu.memory_space<vmem>>, vector<1x128x8xbf16>
    %16 = vector.shape_cast %15 : vector<1x128x8xbf16> to vector<128x8xbf16>
    %c2_21 = arith.constant 2 : index
    %c0_22 = arith.constant 0 : index
    %c0_23 = arith.constant 0 : index
    %17 = vector.load %arg3[%c2_21, %c0_22, %c0_23] : memref<9x8x16xbf16, #tpu.memory_space<vmem>>, vector<1x8x16xbf16>
    %18 = vector.shape_cast %17 : vector<1x8x16xbf16> to vector<8x16xbf16>
    %cst_24 = arith.constant dense<0.000000e+00> : vector<128x16xf32>
    %19 = tpu.matmul %16, %18, %cst_24 {dimension_numbers = #tpu.dot_dimension_numbers<[1], [0], [0], [1], [0, 0, 1, 1], [], []>} : vector<128x8xbf16>, vector<8x16xbf16>, vector<128x16xf32> -> vector<128x16xf32>
    %20 = arith.addf %14, %19 : vector<128x16xf32>
    %c0_25 = arith.constant 0 : index
    %c0_26 = arith.constant 0 : index
    %21 = vector.load %arg6[%c0_25, %c0_26] : memref<128x16xf32, #tpu.memory_space<vmem>>, vector<128x16xf32>
    tpu.vector_store %arg6[%c0_25, %c0_26], %20 {strides = array<i32>} : memref<128x16xf32, #tpu.memory_space<vmem>>, vector<128x16xf32>,
    %c0_27 = arith.constant 0 : index
    %c0_28 = arith.constant 0 : index
    %22 = vector.load %arg6[%c0_27, %c0_28] : memref<128x16xf32, #tpu.memory_space<vmem>>, vector<128x16xf32>
    %c0_29 = arith.constant 0 : index
    %c16 = arith.constant 16 : index
    %c0_30 = arith.constant 0 : index
    %23 = vector.load %arg2[%c0_29, %c16, %c0_30] : memref<1x176x8xbf16, #tpu.memory_space<vmem>>, vector<1x128x8xbf16>
    %24 = vector.shape_cast %23 : vector<1x128x8xbf16> to vector<128x8xbf16>
    %c3 = arith.constant 3 : index
    %c0_31 = arith.constant 0 : index
    %c0_32 = arith.constant 0 : index
    %25 = vector.load %arg3[%c3, %c0_31, %c0_32] : memref<9x8x16xbf16, #tpu.memory_space<vmem>>, vector<1x8x16xbf16>
    %26 = vector.shape_cast %25 : vector<1x8x16xbf16> to vector<8x16xbf16>
    %cst_33 = arith.constant dense<0.000000e+00> : vector<128x16xf32>
    %27 = tpu.matmul %24, %26, %cst_33 {dimension_numbers = #tpu.dot_dimension_numbers<[1], [0], [0], [1], [0, 0, 1, 1], [], []>} : vector<128x8xbf16>, vector<8x16xbf16>, vector<128x16xf32> -> vector<128x16xf32>
    %28 = arith.addf %22, %27 : vector<128x16xf32>
    %c0_34 = arith.constant 0 : index
    %c0_35 = arith.constant 0 : index
    %29 = vector.load %arg6[%c0_34, %c0_35] : memref<128x16xf32, #tpu.memory_space<vmem>>, vector<128x16xf32>
    tpu.vector_store %arg6[%c0_34, %c0_35], %28 {strides = array<i32>} : memref<128x16xf32, #tpu.memory_space<vmem>>, vector<128x16xf32>,
    %c0_36 = arith.constant 0 : index
    %c0_37 = arith.constant 0 : index
    %30 = vector.load %arg6[%c0_36, %c0_37] : memref<128x16xf32, #tpu.memory_space<vmem>>, vector<128x16xf32>
    %c0_38 = arith.constant 0 : index
    %c17 = arith.constant 17 : index
    %c0_39 = arith.constant 0 : index
    %31 = vector.load %arg2[%c0_38, %c17, %c0_39] : memref<1x176x8xbf16, #tpu.memory_space<vmem>>, vector<1x128x8xbf16>
    %32 = vector.shape_cast %31 : vector<1x128x8xbf16> to vector<128x8xbf16>
    %c4 = arith.constant 4 : index
    %c0_40 = arith.constant 0 : index
    %c0_41 = arith.constant 0 : index
    %33 = vector.load %arg3[%c4, %c0_40, %c0_41] : memref<9x8x16xbf16, #tpu.memory_space<vmem>>, vector<1x8x16xbf16>
    %34 = vector.shape_cast %33 : vector<1x8x16xbf16> to vector<8x16xbf16>
    %cst_42 = arith.constant dense<0.000000e+00> : vector<128x16xf32>
    %35 = tpu.matmul %32, %34, %cst_42 {dimension_numbers = #tpu.dot_dimension_numbers<[1], [0], [0], [1], [0, 0, 1, 1], [], []>} : vector<128x8xbf16>, vector<8x16xbf16>, vector<128x16xf32> -> vector<128x16xf32>
    %36 = arith.addf %30, %35 : vector<128x16xf32>
    %c0_43 = arith.constant 0 : index
    %c0_44 = arith.constant 0 : index
    %37 = vector.load %arg6[%c0_43, %c0_44] : memref<128x16xf32, #tpu.memory_space<vmem>>, vector<128x16xf32>
    tpu.vector_store %arg6[%c0_43, %c0_44], %36 {strides = array<i32>} : memref<128x16xf32, #tpu.memory_space<vmem>>, vector<128x16xf32>,
    %c0_45 = arith.constant 0 : index
    %c0_46 = arith.constant 0 : index
    %38 = vector.load %arg6[%c0_45, %c0_46] : memref<128x16xf32, #tpu.memory_space<vmem>>, vector<128x16xf32>
    %c0_47 = arith.constant 0 : index
    %c18 = arith.constant 18 : index
    %c0_48 = arith.constant 0 : index
    %39 = vector.load %arg2[%c0_47, %c18, %c0_48] : memref<1x176x8xbf16, #tpu.memory_space<vmem>>, vector<1x128x8xbf16>
    %40 = vector.shape_cast %39 : vector<1x128x8xbf16> to vector<128x8xbf16>
    %c5 = arith.constant 5 : index
    %c0_49 = arith.constant 0 : index
    %c0_50 = arith.constant 0 : index
    %41 = vector.load %arg3[%c5, %c0_49, %c0_50] : memref<9x8x16xbf16, #tpu.memory_space<vmem>>, vector<1x8x16xbf16>
    %42 = vector.shape_cast %41 : vector<1x8x16xbf16> to vector<8x16xbf16>
    %cst_51 = arith.constant dense<0.000000e+00> : vector<128x16xf32>
    %43 = tpu.matmul %40, %42, %cst_51 {dimension_numbers = #tpu.dot_dimension_numbers<[1], [0], [0], [1], [0, 0, 1, 1], [], []>} : vector<128x8xbf16>, vector<8x16xbf16>, vector<128x16xf32> -> vector<128x16xf32>
    %44 = arith.addf %38, %43 : vector<128x16xf32>
    %c0_52 = arith.constant 0 : index
    %c0_53 = arith.constant 0 : index
    %45 = vector.load %arg6[%c0_52, %c0_53] : memref<128x16xf32, #tpu.memory_space<vmem>>, vector<128x16xf32>
    tpu.vector_store %arg6[%c0_52, %c0_53], %44 {strides = array<i32>} : memref<128x16xf32, #tpu.memory_space<vmem>>, vector<128x16xf32>,
    %c0_54 = arith.constant 0 : index
    %c0_55 = arith.constant 0 : index
    %46 = vector.load %arg6[%c0_54, %c0_55] : memref<128x16xf32, #tpu.memory_space<vmem>>, vector<128x16xf32>
    %c0_56 = arith.constant 0 : index
    %c32 = arith.constant 32 : index
    %c0_57 = arith.constant 0 : index
    %47 = vector.load %arg2[%c0_56, %c32, %c0_57] : memref<1x176x8xbf16, #tpu.memory_space<vmem>>, vector<1x128x8xbf16>
    %48 = vector.shape_cast %47 : vector<1x128x8xbf16> to vector<128x8xbf16>
    %c6 = arith.constant 6 : index
    %c0_58 = arith.constant 0 : index
    %c0_59 = arith.constant 0 : index
    %49 = vector.load %arg3[%c6, %c0_58, %c0_59] : memref<9x8x16xbf16, #tpu.memory_space<vmem>>, vector<1x8x16xbf16>
    %50 = vector.shape_cast %49 : vector<1x8x16xbf16> to vector<8x16xbf16>
    %cst_60 = arith.constant dense<0.000000e+00> : vector<128x16xf32>
    %51 = tpu.matmul %48, %50, %cst_60 {dimension_numbers = #tpu.dot_dimension_numbers<[1], [0], [0], [1], [0, 0, 1, 1], [], []>} : vector<128x8xbf16>, vector<8x16xbf16>, vector<128x16xf32> -> vector<128x16xf32>
    %52 = arith.addf %46, %51 : vector<128x16xf32>
    %c0_61 = arith.constant 0 : index
    %c0_62 = arith.constant 0 : index
    %53 = vector.load %arg6[%c0_61, %c0_62] : memref<128x16xf32, #tpu.memory_space<vmem>>, vector<128x16xf32>
    tpu.vector_store %arg6[%c0_61, %c0_62], %52 {strides = array<i32>} : memref<128x16xf32, #tpu.memory_space<vmem>>, vector<128x16xf32>,
    %c0_63 = arith.constant 0 : index
    %c0_64 = arith.constant 0 : index
    %54 = vector.load %arg6[%c0_63, %c0_64] : memref<128x16xf32, #tpu.memory_space<vmem>>, vector<128x16xf32>
    %c0_65 = arith.constant 0 : index
    %c33 = arith.constant 33 : index
    %c0_66 = arith.constant 0 : index
    %55 = vector.load %arg2[%c0_65, %c33, %c0_66] : memref<1x176x8xbf16, #tpu.memory_space<vmem>>, vector<1x128x8xbf16>
    %56 = vector.shape_cast %55 : vector<1x128x8xbf16> to vector<128x8xbf16>
    %c7 = arith.constant 7 : index
    %c0_67 = arith.constant 0 : index
    %c0_68 = arith.constant 0 : index
    %57 = vector.load %arg3[%c7, %c0_67, %c0_68] : memref<9x8x16xbf16, #tpu.memory_space<vmem>>, vector<1x8x16xbf16>
    %58 = vector.shape_cast %57 : vector<1x8x16xbf16> to vector<8x16xbf16>
    %cst_69 = arith.constant dense<0.000000e+00> : vector<128x16xf32>
    %59 = tpu.matmul %56, %58, %cst_69 {dimension_numbers = #tpu.dot_dimension_numbers<[1], [0], [0], [1], [0, 0, 1, 1], [], []>} : vector<128x8xbf16>, vector<8x16xbf16>, vector<128x16xf32> -> vector<128x16xf32>
    %60 = arith.addf %54, %59 : vector<128x16xf32>
    %c0_70 = arith.constant 0 : index
    %c0_71 = arith.constant 0 : index
    %61 = vector.load %arg6[%c0_70, %c0_71] : memref<128x16xf32, #tpu.memory_space<vmem>>, vector<128x16xf32>
    tpu.vector_store %arg6[%c0_70, %c0_71], %60 {strides = array<i32>} : memref<128x16xf32, #tpu.memory_space<vmem>>, vector<128x16xf32>,
    %c0_72 = arith.constant 0 : index
    %c0_73 = arith.constant 0 : index
    %62 = vector.load %arg6[%c0_72, %c0_73] : memref<128x16xf32, #tpu.memory_space<vmem>>, vector<128x16xf32>
    %c0_74 = arith.constant 0 : index
    %c34 = arith.constant 34 : index
    %c0_75 = arith.constant 0 : index
    %63 = vector.load %arg2[%c0_74, %c34, %c0_75] : memref<1x176x8xbf16, #tpu.memory_space<vmem>>, vector<1x128x8xbf16>
    %64 = vector.shape_cast %63 : vector<1x128x8xbf16> to vector<128x8xbf16>
    %c8 = arith.constant 8 : index
    %c0_76 = arith.constant 0 : index
    %c0_77 = arith.constant 0 : index
    %65 = vector.load %arg3[%c8, %c0_76, %c0_77] : memref<9x8x16xbf16, #tpu.memory_space<vmem>>, vector<1x8x16xbf16>
    %66 = vector.shape_cast %65 : vector<1x8x16xbf16> to vector<8x16xbf16>
    %cst_78 = arith.constant dense<0.000000e+00> : vector<128x16xf32>
    %67 = tpu.matmul %64, %66, %cst_78 {dimension_numbers = #tpu.dot_dimension_numbers<[1], [0], [0], [1], [0, 0, 1, 1], [], []>} : vector<128x8xbf16>, vector<8x16xbf16>, vector<128x16xf32> -> vector<128x16xf32>
    %68 = arith.addf %62, %67 : vector<128x16xf32>
    %c0_79 = arith.constant 0 : index
    %c0_80 = arith.constant 0 : index
    %69 = vector.load %arg6[%c0_79, %c0_80] : memref<128x16xf32, #tpu.memory_space<vmem>>, vector<128x16xf32>
    tpu.vector_store %arg6[%c0_79, %c0_80], %68 {strides = array<i32>} : memref<128x16xf32, #tpu.memory_space<vmem>>, vector<128x16xf32>,
    %c0_81 = arith.constant 0 : index
    %c0_82 = arith.constant 0 : index
    %70 = vector.load %arg4[%c0_81, %c0_82] : memref<1x16xf32, #tpu.memory_space<vmem>>, vector<1x16xf32>
    %c0_83 = arith.constant 0 : index
    %c0_84 = arith.constant 0 : index
    %71 = vector.load %arg6[%c0_83, %c0_84] : memref<128x16xf32, #tpu.memory_space<vmem>>, vector<128x16xf32>
    %72 = vector.broadcast %70 : vector<1x16xf32> to vector<128x16xf32>
    %73 = arith.addf %71, %72 : vector<128x16xf32>
    %cst_85 = arith.constant 0.000000e+00 : f32
    %74 = vector.broadcast %cst_85 : f32 to vector<128x16xf32>
    %75 = arith.maximumf %73, %74 : vector<128x16xf32>
    %76 = tpu.iota {dimensions = array<i32: 0>} : vector<128x1xi32>
    %c16_i32 = arith.constant 16 : i32
    %c0_i32 = arith.constant 0 : i32
    %77 = arith.cmpi eq, %c16_i32, %c0_i32 : i32
    %c1_i32 = arith.constant 1 : i32
    %78 = arith.select %77, %c1_i32, %c16_i32 : i32
    %79 = vector.broadcast %78 : i32 to vector<128x1xi32>
    %80 = arith.remsi %76, %79 : vector<128x1xi32>
    %c0_i32_86 = arith.constant 0 : i32
    %81 = vector.broadcast %c0_i32_86 : i32 to vector<128x1xi32>
    %82 = arith.cmpi ne, %80, %81 : vector<128x1xi32>
    %c0_i32_87 = arith.constant 0 : i32
    %83 = vector.broadcast %c0_i32_87 : i32 to vector<128x1xi32>
    %84 = arith.cmpi slt, %80, %83 : vector<128x1xi32>
    %c0_i32_88 = arith.constant 0 : i32
    %85 = arith.cmpi slt, %78, %c0_i32_88 : i32
    %86 = vector.broadcast %85 : i1 to vector<128x1xi1>
    %87 = vector.broadcast %86 : vector<128x1xi1> to vector<128x1xi1>
    %88 = arith.xori %84, %87 : vector<128x1xi1>
    %89 = arith.andi %88, %82 : vector<128x1xi1>
    %90 = vector.broadcast %78 : i32 to vector<128x1xi32>
    %91 = arith.addi %80, %90 : vector<128x1xi32>
    %92 = arith.select %89, %91, %80 : vector<128x1xi1>, vector<128x1xi32>
    %c8_i32 = arith.constant 8 : i32
    %93 = vector.broadcast %c8_i32 : i32 to vector<128x1xi32>
    %94 = arith.cmpi slt, %92, %93 : vector<128x1xi32>
    %cst_89 = arith.constant 0.000000e+00 : f32
    %95 = vector.shape_cast %94 : vector<128x1xi1> to vector<128x1xi1>
    %96 = vector.broadcast %95 : vector<128x1xi1> to vector<128x16xi1>
    %97 = vector.broadcast %cst_89 : f32 to vector<128x16xf32>
    %98 = arith.select %96, %75, %97 : vector<128x16xi1>, vector<128x16xf32>
    %99 = arith.truncf %98 : vector<128x16xf32> to vector<128x16xbf16>
    %c0_90 = arith.constant 0 : index
    %c17_91 = arith.constant 17 : index
    %c0_92 = arith.constant 0 : index
    %100 = vector.load %arg5[%c0_90, %c17_91, %c0_92] : memref<1x176x16xbf16, #tpu.memory_space<vmem>>, vector<1x128x16xbf16>
    %101 = vector.shape_cast %100 : vector<1x128x16xbf16> to vector<128x16xbf16>
    %102 = vector.shape_cast %99 : vector<128x16xbf16> to vector<1x128x16xbf16>
    tpu.vector_store %arg5[%c0_90, %c17_91, %c0_92], %102 {strides = array<i32>} : memref<1x176x16xbf16, #tpu.memory_space<vmem>>, vector<1x128x16xbf16>,
    %cst_93 = arith.constant 0.000000e+00 : bf16
    %103 = vector.broadcast %cst_93 : bf16 to vector<17x16xbf16>
    %c0_94 = arith.constant 0 : index
    %c0_95 = arith.constant 0 : index
    %c0_96 = arith.constant 0 : index
    %104 = vector.load %arg5[%c0_94, %c0_95, %c0_96] : memref<1x176x16xbf16, #tpu.memory_space<vmem>>, vector<1x17x16xbf16>
    %105 = vector.shape_cast %104 : vector<1x17x16xbf16> to vector<17x16xbf16>
    %106 = vector.shape_cast %103 : vector<17x16xbf16> to vector<1x17x16xbf16>
    tpu.vector_store %arg5[%c0_94, %c0_95, %c0_96], %106 {strides = array<i32>} : memref<1x176x16xbf16, #tpu.memory_space<vmem>>, vector<1x17x16xbf16>,
    %cst_97 = arith.constant 0.000000e+00 : bf16
    %107 = vector.broadcast %cst_97 : bf16 to vector<31x16xbf16>
    %c0_98 = arith.constant 0 : index
    %c145 = arith.constant 145 : index
    %c0_99 = arith.constant 0 : index
    %108 = vector.load %arg5[%c0_98, %c145, %c0_99] : memref<1x176x16xbf16, #tpu.memory_space<vmem>>, vector<1x31x16xbf16>
    %109 = vector.shape_cast %108 : vector<1x31x16xbf16> to vector<31x16xbf16>
    %110 = vector.shape_cast %107 : vector<31x16xbf16> to vector<1x31x16xbf16>
    tpu.vector_store %arg5[%c0_98, %c145, %c0_99], %110 {strides = array<i32>} : memref<1x176x16xbf16, #tpu.memory_space<vmem>>, vector<1x31x16xbf16>,
    return
  }
  func.func @transform_0(%arg0: i32, %arg1: i32) -> (i32, i32, i32) {
    %c0_i32 = arith.constant 0 : i32
    %c0_i32_0 = arith.constant 0 : i32
    %c0_i32_1 = arith.constant 0 : i32
    return %arg0, %c0_i32, %c0_i32_0 : i32, i32, i32
  }
  func.func @transform_1(%arg0: i32, %arg1: i32) -> (i32, i32, i32) {
    %c0_i32 = arith.constant 0 : i32
    %c0_i32_0 = arith.constant 0 : i32
    %c0_i32_1 = arith.constant 0 : i32
    return %c0_i32, %c0_i32_0, %arg1 : i32, i32, i32
  }
  func.func @transform_2(%arg0: i32, %arg1: i32) -> (i32, i32) {
    %c0_i32 = arith.constant 0 : i32
    %c0_i32_0 = arith.constant 0 : i32
    return %c0_i32, %arg1 : i32, i32
  }
  func.func @transform_3(%arg0: i32, %arg1: i32) -> (i32, i32, i32) {
    %c0_i32 = arith.constant 0 : i32
    %c0_i32_0 = arith.constant 0 : i32
    return %arg0, %c0_i32, %arg1 : i32, i32, i32
  }
}

</mosaic_0001>

<bundles_post_ra>
// kernel: tpu_custom_call.1
= control target key start
LH: loop header
LB: loop body
LE: loop exit
PB: predicated region body
PF: predicated region fallthrough
CT: control target
= control target key end

     0   :  { %s3285_s12 = smov 0   ;;  %s3287_s13 = smov 0   ;;  %s4007_s0 = inlined_call_operand.vmem [shape: bf16[2,176,8], index: 0, kind: input, shape index: {}]   ;;  %s4008_s1 = inlined_call_operand.vmem [shape: bf16[9,8,16], index: 1, kind: input, shape index: {}]   ;;  %s4009_s2 = inlined_call_operand.vmem [shape: f32[1,16], index: 2, kind: input, shape index: {}]   ;;  %s4010_s3 = inlined_call_operand.vmem [shape: bf16[2,176,16], index: 3, kind: output, shape index: {}]  }
   0x1   :  { %s3289_s14 = smov 0  }
   0x2 LB: > { %s25_s15 = sadd.s32 1, %s3258_s13  ;;  %p2765_p0 = scmp.ge.s32.totalorder %s3262_s14, 1  ;;  %s3262_s14 = sphi %s3289_s14, %s13_s14   ;;  %s3258_s13 = sphi %s3287_s13, %s4018_s13   ;;  %s3254_s12 = sphi %s3285_s12, %s4017_s12  }
   0x3   : > { %p27_p1 = scmp.ge.s32.totalorder %s25_s15, 2  ;;  %p168_p2 = scmp.lt.s32.totalorder %s3262_s14, 3 }
   0x5   : > { %s4020_s15 = smov (%p27_p1, %s25_s15), 0  ;;  %p169_p3 = pnand %p2765_p0, %p168_p2 }
   0x6   : > { %p202_p4 = scmp.lt.s32.totalorder (!%p169_p3), %s3254_s12, 1 }
   0x7   : > { %172 = sbr.rel (%p169_p3) target bundleno = 476 (0x1dc), region = 32 }
   0xc   : > { %v239_v0 = vld [vmem:[%s4008_s1] sm:$0xf]  ;;  %vm305_vm0 = vcmask 1043456   ;;  %v2808_v2 = vld [vmem:[%s4008_s1 + $0x4] sm:$0xf]  ;;  %s4022_s12 = smov (!%p202_p4, %s3254_s12), 1 }
   0xd   : > { %v307_v1 = vsel %vm305_vm0, %v239_v0, 0  ;;  %v2849_v3 = vld [vmem:[%s4008_s1 + $0x8] sm:$0xf]  ;;  %v547_v4 = vsel %vm305_vm0, %v2808_v2, 0  ;;  %v2890_v6 = vld [vmem:[%s4008_s1 + $0xc] sm:$0xf] }
   0xe   : > { %3210 = vmatpush.bf16.msra.mxu1 %v307_v1  ;;  %3211 = vmatpush.bf16.msra.mxu2 %v307_v1  ;;  %v751_v5 = vsel %vm305_vm0, %v2849_v3, 0  ;;  %v933_v7 = vsel %vm305_vm0, %v2890_v6, 0  ;;  %v2931_v8 = vld [vmem:[%s4008_s1 + $0x10] sm:$0xf]  ;;  %s3213_s26 = smul.u32 88, %s4022_s12  ;;  %vm280_vm1 = vcmask 64512  }
   0xf   : > { %3212 = vmatpush.bf16.msra.mxu3 %v307_v1  ;;  %v1187_v9 = vsel %vm305_vm0, %v2931_v8, 0  ;;  %316 = vmatpush.bf16.msra.mxu0 %v307_v1  ;;  %v2972_v14 = vld [vmem:[%s4008_s1 + $0x14] sm:$0xf]  ;;  %v3013_v16 = vld [vmem:[%s4008_s1 + $0x18] sm:$0xf]  ;;  %vm708_vm3 = vcmask 1046528  }
  0x10   : > { %s3331_s29 = scalar_lea.vmem %s4007_s0, %s3213_s26  ;;  %v1390_v15 = vsel %vm305_vm0, %v2972_v14, 0  ;;  %v1572_v17 = vsel %vm305_vm0, %v3013_v16, 0  ;;  %v3054_v18 = vld [vmem:[%s4008_s1 + $0x1c] sm:$0xf]  ;;  %v3095_v29 = vld [vmem:[%s4008_s1 + $0x20] sm:$0xf]  ;;  %s3785_s17 = scalar_lea.vmem %s4010_s3, %s3213_s26 }
  0x11   : > { %v3140_v10 = vld [vmem:[%s3331_s29 + $0x10] sm:$0xff]  ;;  %v3142_v11 = vld [vmem:[%s3331_s29 + $0x20] sm:$0xff]  ;;  %v1826_v19 = vsel %vm305_vm0, %v3054_v18, 0  ;;  %v3141_v20 = vld [vmem:[%s3331_s29 + $0x18] sm:$0xff]  ;;  %v2029_v33 = vsel %vm305_vm0, %v3095_v29, 0  ;;  %vm358_vm4 = vcmask 130048  }
  0x12   : > { %556 = vmatpush.bf16.msrb.mxu1 %v547_v4  ;;  %760 = vmatpush.bf16.msrb.mxu2 %v751_v5  ;;  %v3144_v12 = vld [vmem:[%s3331_s29 + $0x30] sm:$0xff]  ;;  %v3138_v13 = vld [vmem:[%s3331_s29] sm:$0xff]  ;;  %v3143_v21 = vld [vmem:[%s3331_s29 + $0x28] sm:$0xff]  ;;  %vm453_vm2 = vsmask.f32 7424  ;;  %vm2616_vm5 = vcmask 125952  }
  0x13   : > { %942 = vmatpush.bf16.msrb.mxu3 %v933_v7  ;;  %1196 = vmatpush.bf16.msrb.mxu0 %v1187_v9  ;;  %v3145_v22 = vld [vmem:[%s3331_s29 + $0x38] sm:$0xff]  ;;  %v3146_v23 = vld [vmem:[%s3331_s29] sm:$0xff]  ;;  %v3139_v24 = vld [vmem:[%s3331_s29 + $0x8] sm:$0xff]  ;;  %vm2453_vm6 = vsmask.f32 256  ;;  %vm2638_vm7 = vcmask 122880  }
  0x14   : > { %2802 = vmatmul.msk.bf16.vlgmr.msra.gmra.mxu1 %vm280_vm1, %v3140_v10  ;;  %2804 = vmatmul.msk.bf16.vlgmr.msra.gmra.mxu2 %vm280_vm1, %v3142_v11  ;;  %v3170_v25 = vld [vmem:[%s3331_s29 + $0x8] sm:$0xff]  ;;  %v457_v27 = vshll.u32 %v3146_v23, 16  ;;  %v2852_v28 = vld [vmem:[%s3331_s29] sm:$0xe]  ;;  %v3154_v30 = vld [vmem:[%s3331_s29] sm:$0xf0] }
  0x15   : > { %2806 = vmatmul.msk.bf16.vlgmr.msra.gmra.mxu3 %vm280_vm1, %v3144_v12  ;;  %2800 = vmatmul.msk.bf16.vlgmr.msra.gmra.mxu0 %vm280_vm1, %v3138_v13  ;;  %v3147_v26 = vld [vmem:[%s3331_s29 + $0x8] sm:$0xff]  ;;  %v3171_v31 = vld [vmem:[%s3331_s29 + $0x10] sm:$0xff]  ;;  %v1097_v32 = vshll.u32 %v3170_v25, 16  ;;  %v455_v34 = vshrl.u32 %v3146_v23, 16  ;;  %v2853_v38 = vor.u32 %v3154_v30, %v2852_v28  ;;  %v1095_v39 = vshrl.u32 %v3170_v25, 16  ;;  %v3172_v53 = vld [vmem:[%s3331_s29 + $0x18] sm:$0xff] }
  0x16   : > { %1399 = vmatpush.bf16.msra.mxu1 %v1390_v15  ;;  %1581 = vmatpush.bf16.msra.mxu2 %v1572_v17  ;;  %v459_v35 = vrot.slane %v457_v27, 1  ;;  %v462_v36 = vshll.u32 %v3147_v26, 16  ;;  %v3155_v37 = vld [vmem:[%s3331_s29 + $0x8] sm:$0xff]  ;;  %v1102_v41 = vshll.u32 %v3171_v31, 16  ;;  %v3148_v52 = vld [vmem:[%s3331_s29 + $0x10] sm:$0xff]  ;;  %v466_v54 = vshrl.u32 %v3147_v26, 16  ;;  %vm3803_vm8 = vmand %vm2638_vm7, %vm2453_vm6 }
  0x17   : > { %1835 = vmatpush.bf16.msra.mxu3 %v1826_v19  ;;  %2038 = vmatpush.bf16.msra.mxu0 %v2029_v33  ;;  %v1099_v40 = vrot.slane %v1097_v32, 1  ;;  %v709_v44 = vrot.slane %v2853_v38, 1  ;;  %v710_v45 = vrot.slane %v3155_v37, 1  ;;  %v3162_v50 = vld [vmem:[%s3331_s29 + $0x8] sm:$0xff]  ;;  %v470_v55 = vshll.u32 %v3148_v52, 16  ;;  %v3156_v56 = vld [vmem:[%s3331_s29 + $0x10] sm:$0xff] }
  0x18   : > { %v460_v42 = vor.u32 %v459_v35, %v455_v34  ;;  %v464_v43 = vrot.slane %v462_v36, 1  ;;  %v1104_v47 = vrot.slane %v1102_v41, 1  ;;  %v1106_v57 = vshrl.u32 %v3171_v31, 16  ;;  %v3163_v2 = vld [vmem:[%s3331_s29 + $0x10] sm:$0xff]  ;;  %v3149_v4 = vld [vmem:[%s3331_s29 + $0x18] sm:$0xff]  ;;  %v3173_v5 = vld [vmem:[%s3331_s29 + $0x20] sm:$0xff] }
  0x19   : > { %v1100_v46 = vor.u32 %v1099_v40, %v1095_v39  ;;  %v711_v49 = vsel %vm708_vm3, %v709_v44, %v710_v45  ;;  %v1110_v58 = vshll.u32 %v3172_v53, 16  ;;  %v472_v60 = vrot.slane %v470_v55, 1  ;;  %v3157_v8 = vld [vmem:[%s3331_s29 + $0x18] sm:$0xff]  ;;  %v3165_v34 = vld [vmem:[%s3331_s29 + $0x20] sm:$0xff]  ;;  %v3151_v36 = vld [vmem:[%s3331_s29 + $0x28] sm:$0xff] }
  0x1a   : > { %v465_v48 = vsel %vm453_vm2, %v460_v42, %v464_v43  ;;  %v468_v59 = vor.u32 %v466_v54, %v464_v43  ;;  %v712_v61 = vrot.slane %v3156_v56, 1  ;;  %v1108_v62 = vor.u32 %v1106_v57, %v1104_v47  ;;  %v3164_v18 = vld [vmem:[%s3331_s29 + $0x18] sm:$0xff]  ;;  %v3175_v37 = vld [vmem:[%s3331_s29 + $0x30] sm:$0xff]  ;;  %v3159_v40 = vld [vmem:[%s3331_s29 + $0x28] sm:$0xff] }
  0x1b   : > { %v1105_v51 = vsel %vm453_vm2, %v1100_v46, %v1104_v47  ;;  %v1112_v63 = vrot.slane %v1110_v58, 1  ;;  %v474_v6 = vshrl.u32 %v3148_v52, 16  ;;  %v478_v7 = vshll.u32 %v3149_v4, 16  ;;  %v3152_v52 = vld [vmem:[%s3331_s29 + $0x30] sm:$0xff] }
  0x1c   : > { %v473_v0 = vsel %vm453_vm2, %v468_v59, %v472_v60  ;;  %v713_v1 = vsel %vm708_vm3, %v710_v45, %v712_v61  ;;  %v1114_v9 = vshrl.u32 %v3172_v53, 16  ;;  %v1118_v10 = vshll.u32 %v3173_v5, 16  ;;  %v3176_v53 = vld [vmem:[%s3331_s29 + $0x38] sm:$0xff]  ;;  %v3160_v56 = vld [vmem:[%s3331_s29 + $0x30] sm:$0xff] }
  0x1d   : > { %v1113_v3 = vsel %vm453_vm2, %v1108_v62, %v1112_v63  ;;  %v476_v11 = vor.u32 %v474_v6, %v472_v60  ;;  %v480_v12 = vrot.slane %v478_v7, 1  ;;  %v714_v13 = vrot.slane %v3157_v8, 1  ;;  %v3161_v8 = vld [vmem:[%s3331_s29 + $0x38] sm:$0xff] }
  0x1e   : > { %v1116_v14 = vor.u32 %v1114_v9, %v1112_v63  ;;  %v1120_v15 = vrot.slane %v1118_v10, 1  ;;  %v1122_v25 = vshrl.u32 %v3173_v5, 16  ;;  %v494_v39 = vshll.u32 %v3151_v36, 16  ;;  %v3177_v5 = vld [vmem:[%s3331_s29 + $0x40] sm:$0xff] }
  0x1f   : > { %v481_v16 = vsel %vm453_vm2, %v476_v11, %v480_v12  ;;  %v715_v17 = vsel %vm708_vm3, %v712_v61, %v714_v13  ;;  %v1134_v42 = vshll.u32 %v3175_v37, 16  ;;  %v718_v45 = vrot.slane %v3159_v40, 1 }
  0x20   : > { %v1121_v19 = vsel %vm453_vm2, %v1116_v14, %v1120_v15  ;;  %v1124_v30 = vor.u32 %v1122_v25, %v1120_v15  ;;  %v496_v44 = vrot.slane %v494_v39, 1  ;;  %v498_v54 = vshrl.u32 %v3151_v36, 16  ;;  %v407_v14 = vld [vmem:[%s3331_s29 + $0x40] sm:$0x1] }
  0x21   : > { %v1136_v47 = vrot.slane %v1134_v42, 1  ;;  %v502_v55 = vshll.u32 %v3152_v52, 16  ;;  %v1138_v57 = vshrl.u32 %v3175_v37, 16  ;;  %v1142_v58 = vshll.u32 %v3176_v53, 16 }
  0x22   : > { %v500_v59 = vor.u32 %v498_v54, %v496_v44  ;;  %v720_v61 = vrot.slane %v3160_v56, 1  ;;  %v506_v6 = vshrl.u32 %v3152_v52, 16  ;;  %v1146_v9 = vshrl.u32 %v3176_v53, 16  ;;  %v3194_v52 = vld [vmem:[%s3331_s29 + $0x10] sm:$0xff]  ;;  %v2975_v53 = vld [vmem:[%s3331_s29 + $0x8] sm:$0xe] }
  0x23   : > { %v504_v60 = vrot.slane %v502_v55, 1  ;;  %v1140_v62 = vor.u32 %v1138_v57, %v1136_v47  ;;  %v1144_v63 = vrot.slane %v1142_v58, 1  ;;  %v1150_v10 = vshll.u32 %v3177_v5, 16  ;;  %v3178_v54 = vld [vmem:[%s3331_s29 + $0x8] sm:$0xf0]  ;;  %v3195_v55 = vld [vmem:[%s3331_s29 + $0x18] sm:$0xff] }
  0x24   : > { %2803 = vmatmul.msk.bf16.gmra.mxu1 %vm280_vm1, %v3141_v20  ;;  %2805 = vmatmul.msk.bf16.gmra.mxu2 %vm280_vm1, %v3143_v21  ;;  %v3150_v20 = vld [vmem:[%s3331_s29 + $0x20] sm:$0xff]  ;;  %v3174_v21 = vld [vmem:[%s3331_s29 + $0x28] sm:$0xff]  ;;  %v1154_v37 = vshrl.u32 %v3177_v5, 16  ;;  %v1736_v56 = vshll.u32 %v3194_v52, 16  ;;  %v3098_v58 = vld [vmem:[%s3331_s29 + $0x10] sm:$0xe] }
  0x25   : > { %2807 = vmatmul.msk.bf16.gmra.mxu3 %vm280_vm1, %v3145_v22  ;;  %2801 = vmatmul.msk.bf16.gmra.mxu0 %vm280_vm1, %v3139_v24  ;;  %v482_v22 = vshrl.u32 %v3149_v4, 16  ;;  %v486_v23 = vshll.u32 %v3150_v20, 16  ;;  %v3158_v24 = vld [vmem:[%s3331_s29 + $0x20] sm:$0xff]  ;;  %v1126_v26 = vshll.u32 %v3174_v21, 16  ;;  %v490_v38 = vshrl.u32 %v3150_v20, 16  ;;  %v3153_v4 = vld [vmem:[%s3331_s29 + $0x38] sm:$0xff] }
  0x26   : > { %v716_v29 = vrot.slane %v3158_v24, 1  ;;  %v1130_v41 = vshrl.u32 %v3174_v21, 16  ;;  %v510_v7 = vshll.u32 %v3153_v4, 16  ;;  %v508_v11 = vor.u32 %v506_v6, %v504_v60  ;;  %v3168_v21 = vld [vmem:[%s3331_s29 + $0x38] sm:$0xff] }
  0x27   : > { %v484_v27 = vor.u32 %v482_v22, %v480_v12  ;;  %v488_v28 = vrot.slane %v486_v23, 1  ;;  %v1128_v31 = vrot.slane %v1126_v26, 1  ;;  %v1148_v15 = vor.u32 %v1146_v9, %v1144_v63  ;;  %v662_v23 = vld [vmem:[%s3331_s29 + $0x40] sm:$0x1] }
  0x28   : > { %v717_v33 = vsel %vm708_vm3, %v714_v13, %v716_v29  ;;  %v512_v12 = vrot.slane %v510_v7, 1  ;;  %v722_v13 = vrot.slane %v3161_v8, 1  ;;  %v443_v22 = vunpack.c.l.b16 %v407_v14  ;;  %v3186_v14 = vld [vmem:[%s3331_s29 + $0x10] sm:$0xff] }
  0x29   : > { %v489_v32 = vsel %vm453_vm2, %v484_v27, %v488_v28  ;;  %v1129_v35 = vsel %vm453_vm2, %v1124_v30, %v1128_v31  ;;  %v492_v43 = vor.u32 %v490_v38, %v488_v28  ;;  %v1132_v46 = vor.u32 %v1130_v41, %v1128_v31 }
  0x2a   : > { %v723_v20 = vsel %vm708_vm3, %v720_v61, %v722_v13  ;;  %v452_v27 = vpack.c.b16 %v443_v22, %v443_v22  ;;  %v698_v28 = vunpack.c.l.b16 %v662_v23  ;;  %v3196_v22 = vld [vmem:[%s3331_s29 + $0x20] sm:$0xff]  ;;  %vm2617_vm9 = vsmask.f32 7938 }
  0x2b   : > { %vm3826_vm10 = vmand %vm2616_vm5, %vm2617_vm9  ;;  %vm2454_vm11 = vsmask.f32 4368 }
  0x2c   : > { %vm3852_vm12 = vmor %vm2453_vm6, %vm2454_vm11 }
  0x34   : > { %2841 = vmatmul.msk.bf16.vlgmr.msrb.gmra.mxu1 %vm280_vm1, %v465_v48  ;;  %2882 = vmatmul.msk.bf16.vlgmr.msrb.gmra.mxu2 %vm280_vm1, %v711_v49  ;;  %v497_v48 = vsel %vm453_vm2, %v492_v43, %v496_v44  ;;  %v719_v49 = vsel %vm708_vm3, %v716_v29, %v718_v45 }
  0x35   : > { %2923 = vmatmul.msk.bf16.vlgmr.msrb.gmra.mxu3 %vm280_vm1, %v3162_v50  ;;  %2964 = vmatmul.msk.bf16.vlgmr.msrb.gmra.mxu0 %vm280_vm1, %v1105_v51  ;;  %v3166_v50 = vld [vmem:[%s3331_s29 + $0x28] sm:$0xff]  ;;  %v1137_v51 = vsel %vm453_vm2, %v1132_v46, %v1136_v47 }
  0x44   : > { %2842 = vmatmul.msk.bf16.gmra.mxu1 %vm280_vm1, %v473_v0  ;;  %2883 = vmatmul.msk.bf16.gmra.mxu2 %vm280_vm1, %v713_v1  ;;  %v505_v0 = vsel %vm453_vm2, %v500_v59, %v504_v60  ;;  %v721_v1 = vsel %vm708_vm3, %v718_v45, %v720_v61  ;;  %v3202_v59 = vld [vmem:[%s3331_s29 + $0x10] sm:$0xf0] }
  0x45   : > { %2924 = vmatmul.msk.bf16.gmra.mxu3 %vm280_vm1, %v3163_v2  ;;  %2965 = vmatmul.msk.bf16.gmra.mxu0 %vm280_vm1, %v1113_v3  ;;  %v3167_v2 = vld [vmem:[%s3331_s29 + $0x30] sm:$0xff]  ;;  %v1145_v3 = vsel %vm453_vm2, %v1140_v62, %v1144_v63  ;;  %v2976_v63 = vor.u32 %v3178_v54, %v2975_v53  ;;  %v3099_v5 = vor.u32 %v3202_v59, %v3098_v58  ;;  %v3518_v53 = vld [vmem:[%s3331_s29 + $0x28] sm:$0xff]  ;;  %v3522_v58 = vld [vmem:[%s3331_s29 + $0x20] sm:$0xff] }
  0x46   : > { %v3179_v62 = vld [vmem:[%s3331_s29 + $0x10] sm:$0xff] }
  0x47   : > { %v1348_v6 = vrot.slane %v2976_v63, 1  ;;  %v1349_v7 = vrot.slane %v3179_v62, 1  ;;  %v3528_v63 = vld [vmem:[%s3331_s29 + $0x28] sm:$0xff] }
  0x54   : > { %2843 = vmatmul.msk.bf16.gmra.mxu1 %vm280_vm1, %v481_v16  ;;  %2884 = vmatmul.msk.bf16.gmra.mxu2 %vm280_vm1, %v715_v17  ;;  %v1152_v16 = vrot.slane %v1150_v10, 1  ;;  %v1048_v17 = vld [vmem:[%s3331_s29 + $0x48] sm:$0x1]  ;;  %v1987_v10 = vrot.slane %v3099_v5, 1 }
  0x55   : > { %2925 = vmatmul.msk.bf16.gmra.mxu3 %vm280_vm1, %v3164_v18  ;;  %2966 = vmatmul.msk.bf16.gmra.mxu0 %vm280_vm1, %v1121_v19  ;;  %v513_v19 = vsel %vm453_vm2, %v508_v11, %v512_v12  ;;  %v1084_v26 = vunpack.c.l.b16 %v1048_v17  ;;  %v1350_v17 = vsel %vm708_vm3, %v1348_v6, %v1349_v7 }
  0x56   : > { %v1153_v25 = vsel %vm453_vm2, %v1148_v15, %v1152_v16  ;;  %v1156_v42 = vor.u32 %v1154_v37, %v1152_v16 }
  0x57   : > { %v1093_v29 = vpack.c.b16 %v1084_v26, %v1084_v26 }
  0x59   : > { %v1158_v38 = vshll.u32 %v1093_v29, 16  ;;  %v1745_v29 = vshrl.u32 %v3195_v55, 16 }
  0x5b   : > { %v1160_v43 = vrot.slane %v1158_v38, 1 }
  0x64   : > { %2844 = vmatmul.msk.bf16.gmra.mxu1 %vm280_vm1, %v489_v32  ;;  %2885 = vmatmul.msk.bf16.gmra.mxu2 %vm280_vm1, %v717_v33  ;;  %v514_v33 = vshrl.u32 %v3153_v4, 16  ;;  %v3203_v4 = vld [vmem:[%s3331_s29 + $0x18] sm:$0xff] }
  0x65   : > { %2926 = vmatmul.msk.bf16.gmra.mxu3 %vm280_vm1, %v3165_v34  ;;  %2967 = vmatmul.msk.bf16.gmra.mxu0 %vm280_vm1, %v1129_v35  ;;  %v518_v34 = vshll.u32 %v452_v27, 16  ;;  %v707_v35 = vpack.c.b16 %v698_v28, %v698_v28  ;;  %v1988_v11 = vrot.slane %v3203_v4, 1  ;;  %v3494_v27 = vld [vmem:[%s3331_s29 + $0x18] sm:$0xff] }
  0x66   : > { %v516_v39 = vor.u32 %v514_v33, %v512_v12 }
  0x67   : > { %v520_v40 = vrot.slane %v518_v34, 1  ;;  %v724_v41 = vrot.slane %v707_v35, 1  ;;  %v1351_v35 = vrot.slane %v3494_v27, 1 }
  0x69   : > { %v521_v47 = vsel %vm453_vm2, %v516_v39, %v520_v40 }
  0x74   : > { %2845 = vmatmul.msk.bf16.gmra.mxu1 %vm280_vm1, %v497_v48  ;;  %2886 = vmatmul.msk.bf16.gmra.mxu2 %vm280_vm1, %v719_v49  ;;  %v725_v48 = vsel %vm708_vm3, %v722_v13, %v724_v41  ;;  %v3169_v49 = vld [vmem:[%s3331_s29 + $0x40] sm:$0xff]  ;;  %v3187_v41 = vld [vmem:[%s3331_s29 + $0x18] sm:$0xff] }
  0x75   : > { %2927 = vmatmul.msk.bf16.gmra.mxu3 %vm280_vm1, %v3166_v50  ;;  %2968 = vmatmul.msk.bf16.gmra.mxu0 %vm280_vm1, %v1137_v51  ;;  %v1161_v51 = vsel %vm453_vm2, %v1156_v42, %v1160_v43 }
  0x84   : > { %2846 = vmatmul.msk.bf16.gmra.mxu1 %vm280_vm1, %v505_v0  ;;  %2887 = vmatmul.msk.bf16.gmra.mxu2 %vm280_vm1, %v721_v1  ;;  %v1734_v0 = vshrl.u32 %v3194_v52, 16  ;;  %v1738_v1 = vrot.slane %v1736_v56, 1 }
  0x85   : > { %2928 = vmatmul.msk.bf16.gmra.mxu3 %vm280_vm1, %v3167_v2  ;;  %2969 = vmatmul.msk.bf16.gmra.mxu0 %vm280_vm1, %v1145_v3  ;;  %v1741_v2 = vshll.u32 %v3195_v55, 16 }
  0x86   : > { %v1739_v8 = vor.u32 %v1738_v1, %v1734_v0 }
  0x87   : > { %v1743_v9 = vrot.slane %v1741_v2, 1 }
  0x91   : > { %v328_v18 = vpop.f32.mrf.mxu1 }
  0x92   : > { %363 = vst.msk [vmem:[#allocation2 + $0x20] sm:$0xff] %vm358_vm4, %v328_v18  ;;  %v318_v24 = vpop.f32.mrf.mxu0 }
  0x93   : > { %359 = vst.msk [vmem:[#allocation2] sm:$0xff] %vm358_vm4, %v318_v24 }
  0x94   : > { %2847 = vmatmul.msk.bf16.gmra.mxu1 %vm280_vm1, %v513_v19  ;;  %2888 = vmatmul.msk.bf16.gmra.mxu2 %vm280_vm1, %v723_v20  ;;  %v1744_v19 = vsel %vm453_vm2, %v1739_v8, %v1743_v9 }
  0x95   : > { %2929 = vmatmul.msk.bf16.gmra.mxu3 %vm280_vm1, %v3168_v21  ;;  %2970 = vmatmul.msk.bf16.gmra.mxu0 %vm280_vm1, %v1153_v25  ;;  %v1989_v21 = vsel %vm708_vm3, %v1987_v10, %v1988_v11 }
  0x97   : > { %v338_v30 = vpop.f32.mrf.mxu2 }
  0x98   : > { %367 = vst.msk [vmem:[#allocation2 + $0x40] sm:$0xff] %vm358_vm4, %v338_v30  ;;  %v348_v31 = vpop.f32.mrf.mxu3  ;;  %v1749_v30 = vshll.u32 %v3196_v22, 16 }
  0x99   : > { %v330_v32 = vpop.f32.mrf.mxu1  ;;  %371 = vst.msk [vmem:[#allocation2 + $0x60] sm:$0xff] %vm358_vm4, %v348_v31 }
  0x9a   : > { %364 = vst.msk [vmem:[#allocation2 + $0x28] sm:$0xff] %vm358_vm4, %v330_v32  ;;  %v320_v36 = vpop.f32.mrf.mxu0  ;;  %v375_v13 = vld [vmem:[#allocation2] sm:$0xff]  ;;  %v1751_v37 = vrot.slane %v1749_v30, 1 }
  0x9b   : > { %360 = vst.msk [vmem:[#allocation2 + $0x8] sm:$0xff] %vm358_vm4, %v320_v36  ;;  %v3499_v32 = vld [vmem:[%s3331_s29 + $0x20] sm:$0xff]  ;;  %v1747_v36 = vor.u32 %v1745_v29, %v1743_v9 }
  0x9c   : > { %v1990_v38 = vrot.slane %v3499_v32, 1  ;;  %v3559_v32 = vld [vmem:[%s3331_s29 + $0x28] sm:$0xff] }
  0x9f   : > { %v340_v44 = vpop.f32.mrf.mxu2 }
  0xa0   : > { %368 = vst.msk [vmem:[#allocation2 + $0x48] sm:$0xff] %vm358_vm4, %v340_v44  ;;  %v350_v45 = vpop.f32.mrf.mxu3  ;;  %v1352_v44 = vsel %vm708_vm3, %v1349_v7, %v1351_v35  ;;  %v1992_v7 = vrot.slane %v3528_v63, 1 }
  0xa1   : > { %v333_v46 = vpop.f32.mrf.mxu1  ;;  %372 = vst.msk [vmem:[#allocation2 + $0x68] sm:$0xff] %vm358_vm4, %v350_v45  ;;  %v380_v29 = vld [vmem:[#allocation2 + $0x28] sm:$0xff] }
  0xa2   : > { %365 = vst.msk [vmem:[#allocation2 + $0x30] sm:$0xff] %vm358_vm4, %v333_v46  ;;  %v323_v50 = vpop.f32.mrf.mxu0  ;;  %v376_v25 = vld [vmem:[#allocation2 + $0x8] sm:$0xff]  ;;  %v1752_v46 = vsel %vm453_vm2, %v1747_v36, %v1751_v37 }
  0xa3   : > { %361 = vst.msk [vmem:[#allocation2 + $0x10] sm:$0xff] %vm358_vm4, %v323_v50 }
  0xa4   : > { %2848 = vmatmul.msk.bf16.gmra.mxu1 %vm280_vm1, %v521_v47  ;;  %2889 = vmatmul.msk.bf16.gmra.mxu2 %vm280_vm1, %v725_v48  ;;  %v1991_v48 = vsel %vm708_vm3, %v1988_v11, %v1990_v38  ;;  %v3188_v11 = vld [vmem:[%s3331_s29 + $0x20] sm:$0xff] }
  0xa5   : > { %2930 = vmatmul.msk.bf16.gmra.mxu3 %vm280_vm1, %v3169_v49  ;;  %2971 = vmatmul.msk.bf16.gmra.mxu0 %vm280_vm1, %v1161_v51 }
  0xa7   : > { %v343_v57 = vpop.f32.mrf.mxu2 }
  0xa8   : > { %369 = vst.msk [vmem:[#allocation2 + $0x50] sm:$0xff] %vm358_vm4, %v343_v57  ;;  %v353_v60 = vpop.f32.mrf.mxu3 }
  0xa9   : > { %v335_v61 = vpop.f32.mrf.mxu1  ;;  %373 = vst.msk [vmem:[#allocation2 + $0x70] sm:$0xff] %vm358_vm4, %v353_v60  ;;  %v1753_v60 = vshrl.u32 %v3196_v22, 16 }
  0xaa   : > { %366 = vst.msk [vmem:[#allocation2 + $0x38] sm:$0xff] %vm358_vm4, %v335_v61  ;;  %v325_v3 = vpop.f32.mrf.mxu0  ;;  %v377_v40 = vld [vmem:[#allocation2 + $0x10] sm:$0xff]  ;;  %v1757_v61 = vshll.u32 %v3518_v53, 16 }
  0xab   : > { %362 = vst.msk [vmem:[#allocation2 + $0x18] sm:$0xff] %vm358_vm4, %v325_v3  ;;  %v1353_v3 = vrot.slane %v3522_v58, 1  ;;  %v1755_v5 = vor.u32 %v1753_v60, %v1751_v37  ;;  %v3567_v37 = vld [vmem:[%s3331_s29 + $0x30] sm:$0xff] }
  0xac   : > { %v1759_v6 = vrot.slane %v1757_v61, 1  ;;  %v3597_v61 = vld [vmem:[%s3331_s29 + $0x38] sm:$0xff] }
  0xaf   : > { %v345_v12 = vpop.f32.mrf.mxu2 }
  0xb0   : > { %370 = vst.msk [vmem:[#allocation2 + $0x58] sm:$0xff] %vm358_vm4, %v345_v12  ;;  %v355_v15 = vpop.f32.mrf.mxu3 }
  0xb1   : > { %v558_v16 = vpop.f32.mrf.mxu1  ;;  %374 = vst.msk [vmem:[#allocation2 + $0x78] sm:$0xff] %vm358_vm4, %v355_v15  ;;  %v1354_v15 = vsel %vm708_vm3, %v1351_v35, %v1353_v3 }
  0xb2   : > { %v598_v18 = vadd.f32 %v558_v16, %v375_v13  ;;  %v3484_v20 = vpop.f32.mrf.mxu0  ;;  %v378_v56 = vld [vmem:[#allocation2 + $0x18] sm:$0xff]  ;;  %v379_v13 = vld [vmem:[#allocation2 + $0x20] sm:$0xff] }
  0xb4   : > { %614 = vst.msk [vmem:[#allocation2] sm:$0xff] %vm358_vm4, %v598_v18  ;;  %3005 = vmatmul.msk.bf16.vlgmr.msra.gmra.mxu1 %vm280_vm1, %v1350_v17  ;;  %3046 = vmatmul.msk.bf16.vlgmr.msra.gmra.mxu2 %vm280_vm1, %v3186_v14  ;;  %v1760_v17 = vsel %vm453_vm2, %v1755_v5, %v1759_v6  ;;  %v3602_v5 = vld [vmem:[%s3331_s29 + $0x30] sm:$0xff] }
  0xb5   : > { %3087 = vmatmul.msk.bf16.vlgmr.msra.gmra.mxu3 %vm280_vm1, %v1744_v19  ;;  %3128 = vmatmul.msk.bf16.vlgmr.msra.gmra.mxu0 %vm280_vm1, %v1989_v21  ;;  %v1993_v19 = vsel %vm708_vm3, %v1990_v38, %v1992_v7 }
  0xb7   : > { %v762_v23 = vpop.f32.mrf.mxu2 }
  0xb8   : > { %v944_v24 = vpop.f32.mrf.mxu3 }
  0xb9   : > { %v560_v26 = vpop.f32.mrf.mxu1 }
  0xba   : > { %v599_v28 = vadd.f32 %v560_v26, %v376_v25  ;;  %v3496_v31 = vpop.f32.mrf.mxu0 }
  0xbb   : > { %v630_v33 = vld [vmem:[#allocation2] sm:$0xff] }
  0xbc   : > { %v802_v34 = vadd.f32 %v762_v23, %v630_v33  ;;  %615 = vst.msk [vmem:[#allocation2 + $0x8] sm:$0xff] %vm358_vm4, %v599_v28 }
  0xbe   : > { %818 = vst.msk [vmem:[#allocation2] sm:$0xff] %vm358_vm4, %v802_v34  ;;  %v1761_v34 = vshrl.u32 %v3518_v53, 16 }
  0xbf   : > { %v764_v39 = vpop.f32.mrf.mxu2 }
  0xc0   : > { %v946_v42 = vpop.f32.mrf.mxu3 }
  0xc1   : > { %v563_v43 = vpop.f32.mrf.mxu1 }
  0xc2   : > { %v600_v45 = vadd.f32 %v563_v43, %v377_v40  ;;  %v3508_v47 = vpop.f32.mrf.mxu0  ;;  %v1355_v40 = vrot.slane %v3559_v32, 1 }
  0xc3   : > { %v631_v49 = vld [vmem:[#allocation2 + $0x8] sm:$0xff] }
  0xc4   : > { %v803_v50 = vadd.f32 %v764_v39, %v631_v49  ;;  %616 = vst.msk [vmem:[#allocation2 + $0x10] sm:$0xff] %vm358_vm4, %v600_v45  ;;  %3006 = vmatmul.msk.bf16.gmra.mxu1 %vm280_vm1, %v1352_v44  ;;  %3047 = vmatmul.msk.bf16.gmra.mxu2 %vm280_vm1, %v3187_v41  ;;  %v1994_v44 = vrot.slane %v3567_v37, 1  ;;  %v3189_v49 = vld [vmem:[%s3331_s29 + $0x28] sm:$0xff]  ;;  %v1356_v53 = vsel %vm708_vm3, %v1353_v3, %v1355_v40  ;;  %v382_v3 = vld [vmem:[#allocation2 + $0x38] sm:$0xff] }
  0xc5   : > { %v834_v51 = vld [vmem:[#allocation2] sm:$0xff]  ;;  %3088 = vmatmul.msk.bf16.gmra.mxu3 %vm280_vm1, %v1752_v46  ;;  %3129 = vmatmul.msk.bf16.gmra.mxu0 %vm280_vm1, %v1991_v48 }
  0xc6   : > { %v984_v52 = vadd.f32 %v944_v24, %v834_v51  ;;  %819 = vst.msk [vmem:[#allocation2 + $0x8] sm:$0xff] %vm358_vm4, %v803_v50  ;;  %v3554_v24 = vld [vmem:[%s3331_s29 + $0x30] sm:$0xff] }
  0xc7   : > { %v767_v54 = vpop.f32.mrf.mxu2  ;;  %v1765_v35 = vshll.u32 %v3554_v24, 16  ;;  %v381_v51 = vld [vmem:[#allocation2 + $0x30] sm:$0xff] }
  0xc8   : > { %1000 = vst.msk [vmem:[#allocation2] sm:$0xff] %vm358_vm4, %v984_v52  ;;  %v949_v55 = vpop.f32.mrf.mxu3 }
  0xc9   : > { %v565_v57 = vpop.f32.mrf.mxu1  ;;  %v1767_v43 = vrot.slane %v1765_v35, 1  ;;  %v3640_v35 = vld [vmem:[%s3331_s29 + $0x40] sm:$0xff] }
  0xca   : > { %v601_v59 = vadd.f32 %v565_v57, %v378_v56  ;;  %v3525_v62 = vpop.f32.mrf.mxu0 }
  0xcb   : > { %v632_v0 = vld [vmem:[#allocation2 + $0x10] sm:$0xff] }
  0xcc   : > { %v804_v1 = vadd.f32 %v767_v54, %v632_v0  ;;  %617 = vst.msk [vmem:[#allocation2 + $0x18] sm:$0xff] %vm358_vm4, %v601_v59 }
  0xcd   : > { %v835_v2 = vld [vmem:[#allocation2 + $0x8] sm:$0xff] }
  0xce   : > { %v985_v4 = vadd.f32 %v946_v42, %v835_v2  ;;  %820 = vst.msk [vmem:[#allocation2 + $0x10] sm:$0xff] %vm358_vm4, %v804_v1  ;;  %v1763_v42 = vor.u32 %v1761_v34, %v1759_v6 }
  0xcf   : > { %v1016_v8 = vld [vmem:[#allocation2] sm:$0xff]  ;;  %v769_v9 = vpop.f32.mrf.mxu2 }
  0xd0   : > { %1001 = vst.msk [vmem:[#allocation2 + $0x8] sm:$0xff] %vm358_vm4, %v985_v4  ;;  %v1238_v10 = vadd.f32 %v3484_v20, %v1016_v8  ;;  %v951_v12 = vpop.f32.mrf.mxu3  ;;  %v1773_v8 = vshll.u32 %v3597_v61, 16 }
  0xd1   : > { %v568_v14 = vpop.f32.mrf.mxu1 }
  0xd2   : > { %1254 = vst.msk [vmem:[#allocation2] sm:$0xff] %vm358_vm4, %v1238_v10  ;;  %v602_v16 = vadd.f32 %v568_v14, %v379_v13  ;;  %v3542_v18 = vpop.f32.mrf.mxu0  ;;  %v3610_v10 = vld [vmem:[%s3331_s29 + $0x38] sm:$0xff]  ;;  %v1357_v13 = vrot.slane %v3602_v5, 1 }
  0xd3   : > { %v633_v20 = vld [vmem:[#allocation2 + $0x18] sm:$0xff] }
  0xd4   : > { %v805_v21 = vadd.f32 %v769_v9, %v633_v20  ;;  %618 = vst.msk [vmem:[#allocation2 + $0x20] sm:$0xff] %vm358_vm4, %v602_v16  ;;  %3007 = vmatmul.msk.bf16.gmra.mxu1 %vm280_vm1, %v1354_v15  ;;  %3048 = vmatmul.msk.bf16.gmra.mxu2 %vm280_vm1, %v3188_v11  ;;  %v1775_v16 = vrot.slane %v1773_v8, 1  ;;  %v3683_v8 = vld [vmem:[%s3331_s29 + $0x48] sm:$0xff] }
  0xd5   : > { %v836_v22 = vld [vmem:[#allocation2 + $0x10] sm:$0xff]  ;;  %3089 = vmatmul.msk.bf16.gmra.mxu3 %vm280_vm1, %v1760_v17  ;;  %3130 = vmatmul.msk.bf16.gmra.mxu0 %vm280_vm1, %v1993_v19  ;;  %v1996_v17 = vrot.slane %v3610_v10, 1 }
  0xd6   : > { %v986_v23 = vadd.f32 %v949_v55, %v836_v22  ;;  %821 = vst.msk [vmem:[#allocation2 + $0x18] sm:$0xff] %vm358_vm4, %v805_v21  ;;  %v1768_v55 = vsel %vm453_vm2, %v1763_v42, %v1767_v43  ;;  %v3190_v22 = vld [vmem:[%s3331_s29 + $0x30] sm:$0xff]  ;;  %v3645_v42 = vld [vmem:[%s3331_s29 + $0x38] sm:$0xff] }
  0xd7   : > { %v1017_v25 = vld [vmem:[#allocation2 + $0x8] sm:$0xff]  ;;  %v772_v26 = vpop.f32.mrf.mxu2 }
  0xd8   : > { %1002 = vst.msk [vmem:[#allocation2 + $0x10] sm:$0xff] %vm358_vm4, %v986_v23  ;;  %v1239_v27 = vadd.f32 %v3496_v31, %v1017_v25  ;;  %v954_v28 = vpop.f32.mrf.mxu3 }
  0xd9   : > { %v570_v30 = vpop.f32.mrf.mxu1 }
  0xda   : > { %1255 = vst.msk [vmem:[#allocation2 + $0x8] sm:$0xff] %vm358_vm4, %v1239_v27  ;;  %v603_v33 = vadd.f32 %v570_v30, %v380_v29  ;;  %v3564_v36 = vpop.f32.mrf.mxu0 }
  0xdb   : > { %v634_v38 = vld [vmem:[#allocation2 + $0x20] sm:$0xff] }
  0xdc   : > { %v806_v39 = vadd.f32 %v772_v26, %v634_v38  ;;  %619 = vst.msk [vmem:[#allocation2 + $0x28] sm:$0xff] %vm358_vm4, %v603_v33  ;;  %v1358_v26 = vsel %vm708_vm3, %v1355_v40, %v1357_v13  ;;  %v384_v40 = vld [vmem:[#allocation2 + $0x48] sm:$0xff] }
  0xdd   : > { %v837_v31 = vld [vmem:[#allocation2 + $0x18] sm:$0xff] }
  0xde   : > { %v987_v41 = vadd.f32 %v951_v12, %v837_v31  ;;  %822 = vst.msk [vmem:[#allocation2 + $0x20] sm:$0xff] %vm358_vm4, %v806_v39 }
  0xdf   : > { %v1018_v45 = vld [vmem:[#allocation2 + $0x10] sm:$0xff]  ;;  %v774_v46 = vpop.f32.mrf.mxu2 }
  0xe0   : > { %1003 = vst.msk [vmem:[#allocation2 + $0x18] sm:$0xff] %vm358_vm4, %v987_v41  ;;  %v1240_v48 = vadd.f32 %v3508_v47, %v1018_v45  ;;  %v956_v50 = vpop.f32.mrf.mxu3  ;;  %v1995_v47 = vsel %vm708_vm3, %v1992_v7, %v1994_v44  ;;  %v1769_v7 = vshrl.u32 %v3554_v24, 16  ;;  %v383_v24 = vld [vmem:[#allocation2 + $0x40] sm:$0xff]  ;;  %v1781_v45 = vshll.u32 %v3640_v35, 16 }
  0xe1   : > { %v573_v52 = vpop.f32.mrf.mxu1 }
  0xe2   : > { %1256 = vst.msk [vmem:[#allocation2 + $0x10] sm:$0xff] %vm358_vm4, %v1240_v48  ;;  %v604_v54 = vadd.f32 %v573_v52, %v381_v51  ;;  %v3583_v56 = vpop.f32.mrf.mxu0  ;;  %v1771_v15 = vor.u32 %v1769_v7, %v1767_v43  ;;  %v3653_v48 = vld [vmem:[%s3331_s29 + $0x40] sm:$0xff]  ;;  %v1359_v51 = vrot.slane %v3645_v42, 1 }
  0xe3   : > { %v635_v57 = vld [vmem:[#allocation2 + $0x28] sm:$0xff] }
  0xe4   : > { %v807_v59 = vadd.f32 %v774_v46, %v635_v57  ;;  %620 = vst.msk [vmem:[#allocation2 + $0x30] sm:$0xff] %vm358_vm4, %v604_v54  ;;  %3008 = vmatmul.msk.bf16.gmra.mxu1 %vm280_vm1, %v1356_v53  ;;  %3049 = vmatmul.msk.bf16.gmra.mxu2 %vm280_vm1, %v3189_v49  ;;  %v1783_v54 = vrot.slane %v1781_v45, 1 }
  0xe5   : > { %v838_v58 = vld [vmem:[#allocation2 + $0x20] sm:$0xff]  ;;  %3090 = vmatmul.msk.bf16.gmra.mxu3 %vm280_vm1, %v1768_v55  ;;  %3131 = vmatmul.msk.bf16.gmra.mxu0 %vm280_vm1, %v1995_v47  ;;  %v1998_v55 = vrot.slane %v3653_v48, 1 }
  0xe6   : > { %v988_v60 = vadd.f32 %v954_v28, %v838_v58  ;;  %823 = vst.msk [vmem:[#allocation2 + $0x28] sm:$0xff] %vm358_vm4, %v807_v59  ;;  %v1776_v28 = vsel %vm453_vm2, %v1771_v15, %v1775_v16  ;;  %v3191_v58 = vld [vmem:[%s3331_s29 + $0x38] sm:$0xff]  ;;  %v3688_v15 = vld [vmem:[%s3331_s29 + $0x40] sm:$0xff] }
  0xe7   : > { %v1019_v63 = vld [vmem:[#allocation2 + $0x18] sm:$0xff]  ;;  %v777_v0 = vpop.f32.mrf.mxu2 }
  0xe8   : > { %1004 = vst.msk [vmem:[#allocation2 + $0x20] sm:$0xff] %vm358_vm4, %v988_v60  ;;  %v1241_v1 = vadd.f32 %v3525_v62, %v1019_v63  ;;  %v959_v2 = vpop.f32.mrf.mxu3 }
  0xe9   : > { %v575_v4 = vpop.f32.mrf.mxu1 }
  0xea   : > { %1257 = vst.msk [vmem:[#allocation2 + $0x18] sm:$0xff] %vm358_vm4, %v1241_v1  ;;  %v605_v6 = vadd.f32 %v575_v4, %v382_v3  ;;  %v3607_v9 = vpop.f32.mrf.mxu0 }
  0xeb   : > { %v636_v11 = vld [vmem:[#allocation2 + $0x30] sm:$0xff] }
  0xec   : > { %v808_v12 = vadd.f32 %v777_v0, %v636_v11  ;;  %621 = vst.msk [vmem:[#allocation2 + $0x38] sm:$0xff] %vm358_vm4, %v605_v6  ;;  %v1360_v0 = vsel %vm708_vm3, %v1357_v13, %v1359_v51  ;;  %v386_v13 = vld [vmem:[#allocation2 + $0x58] sm:$0xff] }
  0xed   : > { %v839_v62 = vld [vmem:[#allocation2 + $0x28] sm:$0xff] }
  0xee   : > { %v989_v14 = vadd.f32 %v956_v50, %v839_v62  ;;  %824 = vst.msk [vmem:[#allocation2 + $0x30] sm:$0xff] %vm358_vm4, %v808_v12 }
  0xef   : > { %v1020_v19 = vld [vmem:[#allocation2 + $0x20] sm:$0xff]  ;;  %v779_v20 = vpop.f32.mrf.mxu2 }
  0xf0   : > { %1005 = vst.msk [vmem:[#allocation2 + $0x28] sm:$0xff] %vm358_vm4, %v989_v14  ;;  %v1242_v21 = vadd.f32 %v3542_v18, %v1020_v19  ;;  %v961_v23 = vpop.f32.mrf.mxu3  ;;  %v1997_v18 = vsel %vm708_vm3, %v1994_v44, %v1996_v17  ;;  %v1777_v44 = vshrl.u32 %v3597_v61, 16  ;;  %v385_v61 = vld [vmem:[#allocation2 + $0x50] sm:$0xff]  ;;  %v1789_v19 = vshll.u32 %v3683_v8, 16 }
  0xf1   : > { %v578_v25 = vpop.f32.mrf.mxu1 }
  0xf2   : > { %1258 = vst.msk [vmem:[#allocation2 + $0x20] sm:$0xff] %vm358_vm4, %v1242_v21  ;;  %v606_v27 = vadd.f32 %v578_v25, %v383_v24  ;;  %v3626_v29 = vpop.f32.mrf.mxu0  ;;  %v1779_v53 = vor.u32 %v1777_v44, %v1775_v16  ;;  %v3696_v21 = vld [vmem:[%s3331_s29 + $0x48] sm:$0xff]  ;;  %v1361_v24 = vrot.slane %v3688_v15, 1 }
  0xf3   : > { %v637_v30 = vld [vmem:[#allocation2 + $0x38] sm:$0xff] }
  0xf4   : > { %v809_v33 = vadd.f32 %v779_v20, %v637_v30  ;;  %622 = vst.msk [vmem:[#allocation2 + $0x40] sm:$0xff] %vm358_vm4, %v606_v27  ;;  %3009 = vmatmul.msk.bf16.gmra.mxu1 %vm280_vm1, %v1358_v26  ;;  %3050 = vmatmul.msk.bf16.gmra.mxu2 %vm280_vm1, %v3190_v22  ;;  %v1791_v27 = vrot.slane %v1789_v19, 1 }
  0xf5   : > { %v840_v32 = vld [vmem:[#allocation2 + $0x30] sm:$0xff]  ;;  %3091 = vmatmul.msk.bf16.gmra.mxu3 %vm280_vm1, %v1776_v28  ;;  %3132 = vmatmul.msk.bf16.gmra.mxu0 %vm280_vm1, %v1997_v18  ;;  %v2000_v28 = vrot.slane %v3696_v21, 1 }
  0xf6   : > { %v990_v34 = vadd.f32 %v959_v2, %v840_v32  ;;  %825 = vst.msk [vmem:[#allocation2 + $0x38] sm:$0xff] %vm358_vm4, %v809_v33  ;;  %v1784_v2 = vsel %vm453_vm2, %v1779_v53, %v1783_v54  ;;  %v1687_v33 = vld [vmem:[%s3331_s29 + $0x50] sm:$0x1] }
  0xf7   : > { %v1021_v37 = vld [vmem:[#allocation2 + $0x28] sm:$0xff]  ;;  %v782_v38 = vpop.f32.mrf.mxu2  ;;  %v1723_v44 = vunpack.c.l.b16 %v1687_v33 }
  0xf8   : > { %1006 = vst.msk [vmem:[#allocation2 + $0x30] sm:$0xff] %vm358_vm4, %v990_v34  ;;  %v1243_v39 = vadd.f32 %v3564_v36, %v1021_v37  ;;  %v964_v31 = vpop.f32.mrf.mxu3  ;;  %v3192_v34 = vld [vmem:[%s3331_s29 + $0x40] sm:$0xff] }
  0xf9   : > { %v580_v41 = vpop.f32.mrf.mxu1  ;;  %v387_v37 = vld [vmem:[#allocation2 + $0x60] sm:$0xff]  ;;  %v1732_v48 = vpack.c.b16 %v1723_v44, %v1723_v44 }
  0xfa   : > { %1259 = vst.msk [vmem:[#allocation2 + $0x28] sm:$0xff] %vm358_vm4, %v1243_v39  ;;  %v607_v43 = vadd.f32 %v580_v41, %v384_v40  ;;  %v3650_v46 = vpop.f32.mrf.mxu0  ;;  %v1362_v39 = vsel %vm708_vm3, %v1359_v51, %v1361_v24  ;;  %v1302_v41 = vld [vmem:[%s3331_s29 + $0x48] sm:$0x1] }
  0xfb   : > { %v638_v49 = vld [vmem:[#allocation2 + $0x40] sm:$0xff] }
  0xfc   : > { %v810_v50 = vadd.f32 %v782_v38, %v638_v49  ;;  %623 = vst.msk [vmem:[#allocation2 + $0x48] sm:$0xff] %vm358_vm4, %v607_v43  ;;  %v1941_v49 = vld [vmem:[%s3331_s29 + $0x50] sm:$0x1] }
  0xfd   : > { %v841_v36 = vld [vmem:[#allocation2 + $0x38] sm:$0xff] }
  0xfe   : > { %v991_v52 = vadd.f32 %v961_v23, %v841_v36  ;;  %826 = vst.msk [vmem:[#allocation2 + $0x40] sm:$0xff] %vm358_vm4, %v810_v50  ;;  %v1338_v36 = vunpack.c.l.b16 %v1302_v41  ;;  %v1270_v41 = vld [vmem:[#allocation2] sm:$0xff] }
  0xff   : > { %v1022_v47 = vld [vmem:[#allocation2 + $0x30] sm:$0xff]  ;;  %v784_v57 = vpop.f32.mrf.mxu2 }
 0x100   : > { %1007 = vst.msk [vmem:[#allocation2 + $0x38] sm:$0xff] %vm358_vm4, %v991_v52  ;;  %v1244_v59 = vadd.f32 %v3583_v56, %v1022_v47  ;;  %v966_v60 = vpop.f32.mrf.mxu3  ;;  %v1999_v56 = vsel %vm708_vm3, %v1996_v17, %v1998_v55  ;;  %v1785_v17 = vshrl.u32 %v3640_v35, 16  ;;  %v1977_v52 = vunpack.c.l.b16 %v1941_v49 }
 0x101   : > { %v583_v63 = vpop.f32.mrf.mxu1 }
 0x102   : > { %1260 = vst.msk [vmem:[#allocation2 + $0x30] sm:$0xff] %vm358_vm4, %v1244_v59  ;;  %v608_v1 = vadd.f32 %v583_v63, %v385_v61  ;;  %v3669_v3 = vpop.f32.mrf.mxu0  ;;  %v1787_v26 = vor.u32 %v1785_v17, %v1783_v54  ;;  %v1793_v61 = vshrl.u32 %v3683_v8, 16  ;;  %v1797_v63 = vshll.u32 %v1732_v48, 16 }
 0x103   : > { %v639_v4 = vld [vmem:[#allocation2 + $0x48] sm:$0xff] }
 0x104   : > { %v811_v6 = vadd.f32 %v784_v57, %v639_v4  ;;  %624 = vst.msk [vmem:[#allocation2 + $0x50] sm:$0xff] %vm358_vm4, %v608_v1  ;;  %3010 = vmatmul.msk.bf16.gmra.mxu1 %vm280_vm1, %v1360_v0  ;;  %3051 = vmatmul.msk.bf16.gmra.mxu2 %vm280_vm1, %v3191_v58  ;;  %v1792_v40 = vsel %vm453_vm2, %v1787_v26, %v1791_v27  ;;  %v388_v57 = vld [vmem:[#allocation2 + $0x68] sm:$0xff] }
 0x105   : > { %v842_v5 = vld [vmem:[#allocation2 + $0x40] sm:$0xff]  ;;  %3092 = vmatmul.msk.bf16.gmra.mxu3 %vm280_vm1, %v1784_v2  ;;  %3133 = vmatmul.msk.bf16.gmra.mxu0 %vm280_vm1, %v1999_v56  ;;  %v1347_v58 = vpack.c.b16 %v1338_v36, %v1338_v36  ;;  %v1986_v1 = vpack.c.b16 %v1977_v52, %v1977_v52 }
 0x106   : > { %v992_v7 = vadd.f32 %v964_v31, %v842_v5  ;;  %827 = vst.msk [vmem:[#allocation2 + $0x48] sm:$0xff] %vm358_vm4, %v811_v6  ;;  %v1795_v5 = vor.u32 %v1793_v61, %v1791_v27 }
 0x107   : > { %v1023_v10 = vld [vmem:[#allocation2 + $0x38] sm:$0xff]  ;;  %v787_v11 = vpop.f32.mrf.mxu2 }
 0x108   : > { %1008 = vst.msk [vmem:[#allocation2 + $0x40] sm:$0xff] %vm358_vm4, %v992_v7  ;;  %v1245_v12 = vadd.f32 %v3607_v9, %v1023_v10  ;;  %v969_v62 = vpop.f32.mrf.mxu3  ;;  %v1799_v7 = vrot.slane %v1797_v63, 1  ;;  %v2002_v10 = vrot.slane %v1986_v1, 1 }
 0x109   : > { %v585_v14 = vpop.f32.mrf.mxu1 }
 0x10a   : > { %1261 = vst.msk [vmem:[#allocation2 + $0x38] sm:$0xff] %vm358_vm4, %v1245_v12  ;;  %v609_v16 = vadd.f32 %v585_v14, %v386_v13  ;;  %v3693_v20 = vpop.f32.mrf.mxu0  ;;  %v389_v14 = vld [vmem:[#allocation2 + $0x70] sm:$0xff] }
 0x10b   : > { %v640_v22 = vld [vmem:[#allocation2 + $0x50] sm:$0xff] }
 0x10c   : > { %v812_v9 = vadd.f32 %v787_v11, %v640_v22  ;;  %625 = vst.msk [vmem:[#allocation2 + $0x58] sm:$0xff] %vm358_vm4, %v609_v16  ;;  %v1800_v22 = vsel %vm453_vm2, %v1795_v5, %v1799_v7  ;;  %v3264_v7 = vmov 0  }
 0x10d   : > { %v843_v23 = vld [vmem:[#allocation2 + $0x48] sm:$0xff]  ;;  %2643 = vst.msk [vmem:[%s3785_s17] sm:$0xf] %vm2616_vm5, %v3264_v7 }
 0x10e   : > { %v993_v25 = vadd.f32 %v966_v60, %v843_v23  ;;  %828 = vst.msk [vmem:[#allocation2 + $0x50] sm:$0xff] %vm358_vm4, %v812_v9  ;;  %v2003_v23 = vsel %vm708_vm3, %v2000_v28, %v2002_v10 }
 0x10f   : > { %v1024_v18 = vld [vmem:[#allocation2 + $0x40] sm:$0xff]  ;;  %v789_v30 = vpop.f32.mrf.mxu2  ;;  %2644 = vst.msk [vmem:[%s3785_s17 + $0x4] sm:$0xf] %vm2616_vm5, %v3264_v7 }
 0x110   : > { %1009 = vst.msk [vmem:[#allocation2 + $0x48] sm:$0xff] %vm358_vm4, %v993_v25  ;;  %v1246_v32 = vadd.f32 %v3626_v29, %v1024_v18  ;;  %v971_v35 = vpop.f32.mrf.mxu3  ;;  %v2001_v29 = vsel %vm708_vm3, %v1998_v55, %v2000_v28  ;;  %v390_v18 = vld [vmem:[#allocation2 + $0x78] sm:$0xff] }
 0x111   : > { %v588_v38 = vpop.f32.mrf.mxu1  ;;  %2651 = vst.msk [vmem:[%s3785_s17 + $0x4c] sm:$0xf] %vm2616_vm5, %v3264_v7 }
 0x112   : > { %1262 = vst.msk [vmem:[#allocation2 + $0x40] sm:$0xff] %vm358_vm4, %v1246_v32  ;;  %v610_v31 = vadd.f32 %v588_v38, %v387_v37  ;;  %v3714_v43 = vpop.f32.mrf.mxu0 }
 0x113   : > { %v641_v45 = vld [vmem:[#allocation2 + $0x58] sm:$0xff]  ;;  %2652 = vst.msk [vmem:[%s3785_s17 + $0x50] sm:$0xf] %vm2616_vm5, %v3264_v7 }
 0x114   : > { %v813_v42 = vadd.f32 %v789_v30, %v641_v45  ;;  %626 = vst.msk [vmem:[#allocation2 + $0x60] sm:$0xff] %vm358_vm4, %v610_v31  ;;  %3011 = vmatmul.msk.bf16.gmra.mxu1 %vm280_vm1, %v1362_v39  ;;  %3052 = vmatmul.msk.bf16.gmra.mxu2 %vm280_vm1, %v3192_v34 }
 0x115   : > { %v844_v50 = vld [vmem:[#allocation2 + $0x50] sm:$0xff]  ;;  %3093 = vmatmul.msk.bf16.gmra.mxu3 %vm280_vm1, %v1792_v40  ;;  %3134 = vmatmul.msk.bf16.gmra.mxu0 %vm280_vm1, %v2001_v29  ;;  %2653 = vst.msk [vmem:[%s3785_s17 + $0x54] sm:$0xf] %vm2616_vm5, %v3264_v7 }
 0x116   : > { %v994_v51 = vadd.f32 %v969_v62, %v844_v50  ;;  %829 = vst.msk [vmem:[#allocation2 + $0x58] sm:$0xff] %vm358_vm4, %v813_v42  ;;  %v3193_v62 = vld [vmem:[%s3331_s29 + $0x48] sm:$0xff] }
 0x117   : > { %v1025_v53 = vld [vmem:[#allocation2 + $0x48] sm:$0xff]  ;;  %v792_v54 = vpop.f32.mrf.mxu2 }
 0x118   : > { %1010 = vst.msk [vmem:[#allocation2 + $0x50] sm:$0xff] %vm358_vm4, %v994_v51  ;;  %v1247_v55 = vadd.f32 %v3650_v46, %v1025_v53  ;;  %v974_v47 = vpop.f32.mrf.mxu3  ;;  %v1363_v46 = vrot.slane %v1347_v58, 1  ;;  %v1271_v53 = vld [vmem:[#allocation2 + $0x8] sm:$0xff] }
 0x119   : > { %v590_v59 = vpop.f32.mrf.mxu1 }
 0x11a   : > { %1263 = vst.msk [vmem:[#allocation2 + $0x48] sm:$0xff] %vm358_vm4, %v1247_v55  ;;  %v611_v60 = vadd.f32 %v590_v59, %v388_v57  ;;  %v3732_v0 = vpop.f32.mrf.mxu0  ;;  %v1364_v17 = vsel %vm708_vm3, %v1361_v24, %v1363_v46 }
 0x11b   : > { %v642_v2 = vld [vmem:[#allocation2 + $0x60] sm:$0xff] }
 0x11c   : > { %v814_v56 = vadd.f32 %v792_v54, %v642_v2  ;;  %627 = vst.msk [vmem:[#allocation2 + $0x68] sm:$0xff] %vm358_vm4, %v611_v60  ;;  %v1272_v2 = vld [vmem:[#allocation2 + $0x10] sm:$0xff] }
 0x11d   : > { %v845_v4 = vld [vmem:[#allocation2 + $0x58] sm:$0xff] }
 0x11e   : > { %v995_v6 = vadd.f32 %v971_v35, %v845_v4  ;;  %830 = vst.msk [vmem:[#allocation2 + $0x60] sm:$0xff] %vm358_vm4, %v814_v56 }
 0x11f   : > { %v1026_v11 = vld [vmem:[#allocation2 + $0x50] sm:$0xff]  ;;  %v794_v12 = vpop.f32.mrf.mxu2 }
 0x120   : > { %1011 = vst.msk [vmem:[#allocation2 + $0x58] sm:$0xff] %vm358_vm4, %v995_v6  ;;  %v1248_v8 = vadd.f32 %v3669_v3, %v1026_v11  ;;  %v976_v13 = vpop.f32.mrf.mxu3 }
 0x121   : > { %v593_v16 = vpop.f32.mrf.mxu1 }
 0x122   : > { %1264 = vst.msk [vmem:[#allocation2 + $0x50] sm:$0xff] %vm358_vm4, %v1248_v8  ;;  %v612_v19 = vadd.f32 %v593_v16, %v389_v14  ;;  %v3744_v9 = vpop.f32.mrf.mxu0  ;;  %v2640_v16 = vld [vmem:[%s3785_s17 + $0x48] sm:$0x1] }
 0x123   : > { %v643_v3 = vld [vmem:[#allocation2 + $0x68] sm:$0xff] }
 0x124   : > { %v815_v25 = vadd.f32 %v794_v12, %v643_v3  ;;  %628 = vst.msk [vmem:[#allocation2 + $0x70] sm:$0xff] %vm358_vm4, %v612_v19  ;;  %3012 = vmatmul.msk.bf16.gmra.mxu1 %vm280_vm1, %v1364_v17  ;;  %3053 = vmatmul.msk.bf16.gmra.mxu2 %vm280_vm1, %v3193_v62  ;;  %v3792_v12 = vrot.slane %v3264_v7, 7 }
 0x125   : > { %v846_v15 = vld [vmem:[#allocation2 + $0x60] sm:$0xff]  ;;  %3094 = vmatmul.msk.bf16.gmra.mxu3 %vm280_vm1, %v1800_v22  ;;  %3135 = vmatmul.msk.bf16.gmra.mxu0 %vm280_vm1, %v2003_v23  ;;  %v1273_v23 = vld [vmem:[#allocation2 + $0x18] sm:$0xff] }
 0x126   : > { %v996_v24 = vadd.f32 %v974_v47, %v846_v15  ;;  %831 = vst.msk [vmem:[#allocation2 + $0x68] sm:$0xff] %vm358_vm4, %v815_v25  ;;  %v3799_v14 = vrot.slane %v3792_v12, 4 }
 0x127   : > { %v1027_v26 = vld [vmem:[#allocation2 + $0x58] sm:$0xff]  ;;  %v797_v21 = vpop.f32.mrf.mxu2 }
 0x128   : > { %1012 = vst.msk [vmem:[#allocation2 + $0x60] sm:$0xff] %vm358_vm4, %v996_v24  ;;  %v1249_v27 = vadd.f32 %v3693_v20, %v1027_v26  ;;  %v979_v28 = vpop.f32.mrf.mxu3 }
 0x129   : > { %v595_v30 = vpop.f32.mrf.mxu1 }
 0x12a   : > { %1265 = vst.msk [vmem:[#allocation2 + $0x58] sm:$0xff] %vm358_vm4, %v1249_v27  ;;  %v613_v33 = vadd.f32 %v595_v30, %v390_v18  ;;  %v3758_v32 = vpop.f32.mrf.mxu0 }
 0x12b   : > { %v644_v34 = vld [vmem:[#allocation2 + $0x70] sm:$0xff] }
 0x12c   : > { %v816_v35 = vadd.f32 %v797_v21, %v644_v34  ;;  %629 = vst.msk [vmem:[#allocation2 + $0x78] sm:$0xff] %vm358_vm4, %v613_v33  ;;  %v1274_v33 = vld [vmem:[#allocation2 + $0x20] sm:$0xff] }
 0x12d   : > { %v847_v37 = vld [vmem:[#allocation2 + $0x68] sm:$0xff] }
 0x12e   : > { %v997_v38 = vadd.f32 %v976_v13, %v847_v37  ;;  %832 = vst.msk [vmem:[#allocation2 + $0x70] sm:$0xff] %vm358_vm4, %v816_v35 }
 0x12f   : > { %v1028_v39 = vld [vmem:[#allocation2 + $0x60] sm:$0xff]  ;;  %v799_v31 = vpop.f32.mrf.mxu2 }
 0x130   : > { %1013 = vst.msk [vmem:[#allocation2 + $0x68] sm:$0xff] %vm358_vm4, %v997_v38  ;;  %v1250_v20 = vadd.f32 %v3714_v43, %v1028_v39  ;;  %v981_v40 = vpop.f32.mrf.mxu3 }
 0x131   : > { %v1401_v44 = vpop.f32.mrf.mxu1 }
 0x132   : > { %1266 = vst.msk [vmem:[#allocation2 + $0x60] sm:$0xff] %vm358_vm4, %v1250_v20  ;;  %v1441_v29 = vadd.f32 %v1401_v44, %v1270_v41  ;;  %v3765_v45 = vpop.f32.mrf.mxu0 }
 0x133   : > { %v645_v49 = vld [vmem:[#allocation2 + $0x78] sm:$0xff] }
 0x134   : > { %v817_v42 = vadd.f32 %v799_v31, %v645_v49  ;;  %1457 = vst.msk [vmem:[#allocation2] sm:$0xff] %vm358_vm4, %v1441_v29  ;;  %v3838_v31 = vld [vmem:[%s4009_s2] ss:$0 sm:$0xff] }
 0x135   : > { %v848_v50 = vld [vmem:[#allocation2 + $0x70] sm:$0xff] }
 0x136   : > { %v998_v36 = vadd.f32 %v979_v28, %v848_v50  ;;  %833 = vst.msk [vmem:[#allocation2 + $0x78] sm:$0xff] %vm358_vm4, %v817_v42  ;;  %v1275_v50 = vld [vmem:[#allocation2 + $0x28] sm:$0xff] }
 0x137   : > { %v1029_v51 = vld [vmem:[#allocation2 + $0x68] sm:$0xff]  ;;  %v1583_v48 = vpop.f32.mrf.mxu2 }
 0x138   : > { %1014 = vst.msk [vmem:[#allocation2 + $0x70] sm:$0xff] %vm358_vm4, %v998_v36  ;;  %v1251_v43 = vadd.f32 %v3732_v0, %v1029_v51  ;;  %v1837_v52 = vpop.f32.mrf.mxu3 }
 0x139   : > { %v1403_v54 = vpop.f32.mrf.mxu1 }
 0x13a   : > { %1267 = vst.msk [vmem:[#allocation2 + $0x68] sm:$0xff] %vm358_vm4, %v1251_v43  ;;  %v1442_v55 = vadd.f32 %v1403_v54, %v1271_v53  ;;  %v3772_v57 = vpop.f32.mrf.mxu0 }
 0x13b   : > { %v1473_v47 = vld [vmem:[#allocation2] sm:$0xff] }
 0x13c   : > { %v1623_v59 = vadd.f32 %v1583_v48, %v1473_v47  ;;  %1458 = vst.msk [vmem:[#allocation2 + $0x8] sm:$0xff] %vm358_vm4, %v1442_v55 }
 0x13d   : > { %v849_v58 = vld [vmem:[#allocation2 + $0x78] sm:$0xff] }
 0x13e   : > { %v999_v60 = vadd.f32 %v981_v40, %v849_v58  ;;  %1639 = vst.msk [vmem:[#allocation2] sm:$0xff] %vm358_vm4, %v1623_v59 }
 0x13f   : > { %v1030_v61 = vld [vmem:[#allocation2 + $0x70] sm:$0xff]  ;;  %v1585_v63 = vpop.f32.mrf.mxu2 }
 0x140   : > { %1015 = vst.msk [vmem:[#allocation2 + $0x78] sm:$0xff] %vm358_vm4, %v999_v60  ;;  %v1252_v0 = vadd.f32 %v3744_v9, %v1030_v61  ;;  %v1839_v1 = vpop.f32.mrf.mxu3  ;;  %v2641_v9 = vsel %vm3803_vm8, %v3799_v14, %v2640_v16 }
 0x141   : > { %v1406_v56 = vpop.f32.mrf.mxu1  ;;  %2642 = vst [vmem:[%s3785_s17 + $0x48] sm:$0x1] %v2641_v9 }
 0x142   : > { %1268 = vst.msk [vmem:[#allocation2 + $0x70] sm:$0xff] %vm358_vm4, %v1252_v0  ;;  %v1443_v4 = vadd.f32 %v1406_v56, %v1272_v2  ;;  %v3789_v10 = vpop.f32.mrf.mxu0  ;;  %v1276_v0 = vld [vmem:[#allocation2 + $0x30] sm:$0xff] }
 0x143   : > { %v1474_v46 = vld [vmem:[#allocation2 + $0x8] sm:$0xff] }
 0x144   : > { %v1624_v6 = vadd.f32 %v1585_v63, %v1474_v46  ;;  %1459 = vst.msk [vmem:[#allocation2 + $0x10] sm:$0xff] %vm358_vm4, %v1443_v4 }
 0x145   : > { %v1655_v5 = vld [vmem:[#allocation2] sm:$0xff] }
 0x146   : > { %v1877_v11 = vadd.f32 %v1837_v52, %v1655_v5  ;;  %1640 = vst.msk [vmem:[#allocation2 + $0x8] sm:$0xff] %vm358_vm4, %v1624_v6  ;;  %v2619_v6 = vld [vmem:[%s3785_s17 + $0x8] sm:$0xf] }
 0x147   : > { %v1031_v8 = vld [vmem:[#allocation2 + $0x78] sm:$0xff]  ;;  %v1588_v62 = vpop.f32.mrf.mxu2 }
 0x148   : > { %1893 = vst.msk [vmem:[#allocation2] sm:$0xff] %vm358_vm4, %v1877_v11  ;;  %v1253_v13 = vadd.f32 %v3758_v32, %v1031_v8  ;;  %v1842_v17 = vpop.f32.mrf.mxu3  ;;  %v2648_v35 = vld [vmem:[%s3785_s17 + $0x48] sm:$0xf] }
 0x149   : > { %v1408_v22 = vpop.f32.mrf.mxu1  ;;  %v2649_v38 = vsel %vm3826_vm10, 0, %v2648_v35 }
 0x14a   : > { %1269 = vst.msk [vmem:[#allocation2 + $0x78] sm:$0xff] %vm358_vm4, %v1253_v13  ;;  %v1444_v25 = vadd.f32 %v1408_v22, %v1273_v23  ;;  %v3820_v28 = vpop.f32.mrf.mxu0 }
 0x14b   : > { %v1475_v3 = vld [vmem:[#allocation2 + $0x10] sm:$0xff]  ;;  %2650 = vst [vmem:[%s3785_s17 + $0x48] sm:$0xf] %v2649_v38 }
 0x14c   : > { %v1625_v15 = vadd.f32 %v1588_v62, %v1475_v3  ;;  %1460 = vst.msk [vmem:[#allocation2 + $0x18] sm:$0xff] %vm358_vm4, %v1444_v25  ;;  %v1277_v3 = vld [vmem:[#allocation2 + $0x38] sm:$0xff] }
 0x14d   : > { %v1656_v24 = vld [vmem:[#allocation2 + $0x8] sm:$0xff] }
 0x14e   : > { %v1878_v26 = vadd.f32 %v1839_v1, %v1656_v24  ;;  %1641 = vst.msk [vmem:[#allocation2 + $0x10] sm:$0xff] %vm358_vm4, %v1625_v15 }
 0x14f   : > { %v1909_v21 = vld [vmem:[#allocation2] sm:$0xff]  ;;  %v1590_v27 = vpop.f32.mrf.mxu2 }
 0x150   : > { %1894 = vst.msk [vmem:[#allocation2 + $0x8] sm:$0xff] %vm358_vm4, %v1878_v26  ;;  %v2080_v18 = vadd.f32 %v3765_v45, %v1909_v21  ;;  %v1844_v30 = vpop.f32.mrf.mxu3 }
 0x151   : > { %v1411_v32 = vpop.f32.mrf.mxu1 }
 0x152   : > { %2096 = vst.msk [vmem:[#allocation2] sm:$0xff] %vm358_vm4, %v2080_v18  ;;  %v1445_v37 = vadd.f32 %v1411_v32, %v1274_v33  ;;  %v3843_v51 = vpop.f32.mrf.mxu0 }
 0x153   : > { %v1476_v40 = vld [vmem:[#allocation2 + $0x18] sm:$0xff] }
 0x154   : > { %1461 = vst.msk [vmem:[#allocation2 + $0x20] sm:$0xff] %vm358_vm4, %v1445_v37  ;;  %v1626_v41 = vadd.f32 %v1590_v27, %v1476_v40 }
 0x155   : > { %v1657_v39 = vld [vmem:[#allocation2 + $0x10] sm:$0xff] }
 0x156   : > { %v1879_v20 = vadd.f32 %v1842_v17, %v1657_v39  ;;  %1642 = vst.msk [vmem:[#allocation2 + $0x18] sm:$0xff] %vm358_vm4, %v1626_v41 }
 0x157   : > { %v1910_v44 = vld [vmem:[#allocation2 + $0x8] sm:$0xff]  ;;  %v1593_v29 = vpop.f32.mrf.mxu2 }
 0x158   : > { %1895 = vst.msk [vmem:[#allocation2 + $0x10] sm:$0xff] %vm358_vm4, %v1879_v20  ;;  %v2081_v45 = vadd.f32 %v3772_v57, %v1910_v44  ;;  %v1847_v49 = vpop.f32.mrf.mxu3  ;;  %v1278_v44 = vld [vmem:[#allocation2 + $0x40] sm:$0xff] }
 0x159   : > { %v2113_v42 = vld [vmem:[#allocation2] sm:$0xff]  ;;  %v1413_v36 = vpop.f32.mrf.mxu1 }
 0x15a   : > { %v2132_v48 = vadd.f32 %v3838_v31, %v2113_v42  ;;  %2097 = vst.msk [vmem:[#allocation2 + $0x8] sm:$0xff] %vm358_vm4, %v2081_v45  ;;  %v1446_v43 = vadd.f32 %v1413_v36, %v1275_v50  ;;  %v3858_v7 = vpop.f32.mrf.mxu0 }
 0x15b   : > { %v1477_v53 = vld [vmem:[#allocation2 + $0x20] sm:$0xff] }
 0x15c   : > { %v2148_v52 = vmax.f32 %v2132_v48, 0.0  ;;  %1462 = vst.msk [vmem:[#allocation2 + $0x28] sm:$0xff] %vm358_vm4, %v1446_v43  ;;  %v1627_v54 = vadd.f32 %v1593_v29, %v1477_v53 }
 0x15d   : > { %v1658_v58 = vld [vmem:[#allocation2 + $0x18] sm:$0xff] }
 0x15e   : > { %v2437_v55 = vpack.c.bf16 %v2148_v52, %v2148_v52  ;;  %1643 = vst.msk [vmem:[#allocation2 + $0x20] sm:$0xff] %vm358_vm4, %v1627_v54  ;;  %v1880_v63 = vadd.f32 %v1844_v30, %v1658_v58  ;;  %v1279_v58 = vld [vmem:[#allocation2 + $0x48] sm:$0xff] }
 0x15f   : > { %v1911_v47 = vld [vmem:[#allocation2 + $0x10] sm:$0xff]  ;;  %v1595_v57 = vpop.f32.mrf.mxu2 }
 0x160   : > { %v2457_v59 = vshrl.u32 %v2437_v55, 16  ;;  %v2082_v60 = vadd.f32 %v3789_v10, %v1911_v47  ;;  %v1849_v61 = vpop.f32.mrf.mxu3  ;;  %v2460_v56 = vshll.u32 %v2437_v55, 16  ;;  %1896 = vst.msk [vmem:[#allocation2 + $0x18] sm:$0xff] %vm358_vm4, %v1880_v63 }
 0x161   : > { %v1416_v1 = vpop.f32.mrf.mxu1 }
 0x162   : > { %v2459_v2 = vrot.slane %v2457_v59, 7  ;;  %2098 = vst.msk [vmem:[#allocation2 + $0x10] sm:$0xff] %vm358_vm4, %v2082_v60  ;;  %v1447_v4 = vadd.f32 %v1416_v1, %v1276_v0  ;;  %v2055_v32 = vpop.f32.mrf.mxu0 }
 0x163   : > { %v1478_v5 = vld [vmem:[#allocation2 + $0x28] sm:$0xff] }
 0x164   : > { %v2462_v10 = vor.u32 %v2460_v56, %v2459_v2  ;;  %v2463_v11 = vrot.slane %v2459_v2, 4  ;;  %v1628_v8 = vadd.f32 %v1595_v57, %v1478_v5  ;;  %1463 = vst.msk [vmem:[#allocation2 + $0x30] sm:$0xff] %vm358_vm4, %v1447_v4 }
 0x165   : > { %v1659_v16 = vld [vmem:[#allocation2 + $0x20] sm:$0xff] }
 0x166   : > { %v2471_v62 = vsel %vm3852_vm12, %v2463_v11, %v3792_v12  ;;  %v2620_v13 = vsel %vm3826_vm10, %v2462_v10, %v2619_v6  ;;  %1644 = vst.msk [vmem:[#allocation2 + $0x28] sm:$0xff] %vm358_vm4, %v1628_v8  ;;  %v1881_v17 = vadd.f32 %v1847_v49, %v1659_v16 }
 0x167   : > { %2621 = vst [vmem:[%s3785_s17 + $0x8] sm:$0xf] %v2620_v13  ;;  %v1598_v22 = vpop.f32.mrf.mxu2  ;;  %v1912_v24 = vld [vmem:[#allocation2 + $0x18] sm:$0xff] }
 0x168   : > { %2623 = vst.msk [vmem:[%s3785_s17 + $0xc] sm:$0xf] %vm2616_vm5, %v2471_v62  ;;  %v1852_v9 = vpop.f32.mrf.mxu3  ;;  %v2083_v21 = vadd.f32 %v3820_v28, %v1912_v24  ;;  %v1280_v62 = vld [vmem:[#allocation2 + $0x50] sm:$0xff] }
 0x169   : > { %v2115_v23 = vld [vmem:[#allocation2 + $0x10] sm:$0xff]  ;;  %1897 = vst.msk [vmem:[#allocation2 + $0x20] sm:$0xff] %vm358_vm4, %v1881_v17  ;;  %v1418_v25 = vpop.f32.mrf.mxu1 }
 0x16a   : > { %v2134_v15 = vadd.f32 %v3838_v31, %v2115_v23  ;;  %v1448_v26 = vadd.f32 %v1418_v25, %v1277_v3  ;;  %2099 = vst.msk [vmem:[#allocation2 + $0x18] sm:$0xff] %vm358_vm4, %v2083_v21  ;;  %v2057_v55 = vpop.f32.mrf.mxu0 }
 0x16b   : > { %v1479_v27 = vld [vmem:[#allocation2 + $0x30] sm:$0xff] }
 0x16c   : > { %v2150_v18 = vmax.f32 %v2134_v15, 0.0  ;;  %v1629_v30 = vadd.f32 %v1598_v22, %v1479_v27  ;;  %1464 = vst.msk [vmem:[#allocation2 + $0x38] sm:$0xff] %vm358_vm4, %v1448_v26 }
 0x16d   : > { %v1660_v33 = vld [vmem:[#allocation2 + $0x28] sm:$0xff] }
 0x16e   : > { %v2645_v34 = vld [vmem:[%s3785_s17 + $0x8] sm:$0x1]  ;;  %v2439_v35 = vpack.c.bf16 %v2150_v18, %v2150_v18  ;;  %v1882_v37 = vadd.f32 %v1849_v61, %v1660_v33  ;;  %1645 = vst.msk [vmem:[#allocation2 + $0x30] sm:$0xff] %vm358_vm4, %v1629_v30 }
 0x16f   : > { %v2646_v38 = vsel %vm3803_vm8, 0, %v2645_v34  ;;  %v1600_v39 = vpop.f32.mrf.mxu2  ;;  %v1281_v34 = vld [vmem:[#allocation2 + $0x58] sm:$0xff] }
 0x170   : > { %2647 = vst [vmem:[%s3785_s17 + $0x8] sm:$0x1] %v2646_v38  ;;  %v2474_v28 = vshrl.u32 %v2439_v35, 16  ;;  %v1913_v20 = vld [vmem:[#allocation2 + $0x20] sm:$0xff]  ;;  %v1854_v40 = vpop.f32.mrf.mxu3  ;;  %v2477_v49 = vshll.u32 %v2439_v35, 16 }
 0x171   : > { %1898 = vst.msk [vmem:[#allocation2 + $0x28] sm:$0xff] %vm358_vm4, %v1882_v37  ;;  %v2084_v41 = vadd.f32 %v3843_v51, %v1913_v20  ;;  %v1421_v29 = vpop.f32.mrf.mxu1 }
 0x172   : > { %v2476_v45 = vrot.slane %v2474_v28, 7  ;;  %v1449_v42 = vadd.f32 %v1421_v29, %v1278_v44  ;;  %v2060_v16 = vpop.f32.mrf.mxu0 }
 0x173   : > { %2100 = vst.msk [vmem:[#allocation2 + $0x20] sm:$0xff] %vm358_vm4, %v2084_v41  ;;  %v1480_v19 = vld [vmem:[#allocation2 + $0x38] sm:$0xff] }
 0x174   : > { %v2479_v50 = vor.u32 %v2477_v49, %v2476_v45  ;;  %v2481_v36 = vrot.slane %v2476_v45, 4  ;;  %v1630_v48 = vadd.f32 %v1600_v39, %v1480_v19  ;;  %1465 = vst.msk [vmem:[#allocation2 + $0x40] sm:$0xff] %vm358_vm4, %v1449_v42 }
 0x175   : > { %v1661_v43 = vld [vmem:[#allocation2 + $0x30] sm:$0xff] }
 0x176   : > { %v2480_v51 = vsel %vm3852_vm12, %v3799_v14, %v2479_v50  ;;  %v2489_v52 = vsel %vm3852_vm12, %v2481_v36, %v3792_v12  ;;  %v1883_v53 = vadd.f32 %v1852_v9, %v1661_v43  ;;  %1646 = vst.msk [vmem:[#allocation2 + $0x38] sm:$0xff] %vm358_vm4, %v1630_v48  ;;  %v1282_v36 = vld [vmem:[#allocation2 + $0x60] sm:$0xff] }
 0x177   : > { %2624 = vst.msk [vmem:[%s3785_s17 + $0x10] sm:$0xf] %vm2616_vm5, %v2480_v51  ;;  %v1603_v54 = vpop.f32.mrf.mxu2 }
 0x178   : > { %2625 = vst.msk [vmem:[%s3785_s17 + $0x14] sm:$0xf] %vm2616_vm5, %v2489_v52  ;;  %v1914_v47 = vld [vmem:[#allocation2 + $0x28] sm:$0xff]  ;;  %v1857_v57 = vpop.f32.mrf.mxu3 }
 0x179   : > { %1899 = vst.msk [vmem:[#allocation2 + $0x30] sm:$0xff] %vm358_vm4, %v1883_v53  ;;  %v2085_v59 = vadd.f32 %v3858_v7, %v1914_v47  ;;  %v1423_v60 = vpop.f32.mrf.mxu1 }
 0x17a   : > { %v2117_v61 = vld [vmem:[#allocation2 + $0x20] sm:$0xff]  ;;  %v1450_v63 = vadd.f32 %v1423_v60, %v1279_v58  ;;  %v2062_v20 = vpop.f32.mrf.mxu0 }
 0x17b   : > { %v2136_v0 = vadd.f32 %v3838_v31, %v2117_v61  ;;  %2101 = vst.msk [vmem:[#allocation2 + $0x28] sm:$0xff] %vm358_vm4, %v2085_v59  ;;  %v1481_v1 = vld [vmem:[#allocation2 + $0x40] sm:$0xff] }
 0x17c   : > { %v1631_v2 = vadd.f32 %v1603_v54, %v1481_v1  ;;  %1466 = vst.msk [vmem:[#allocation2 + $0x48] sm:$0xff] %vm358_vm4, %v1450_v63 }
 0x17d   : > { %v2152_v56 = vmax.f32 %v2136_v0, 0.0  ;;  %v1662_v4 = vld [vmem:[#allocation2 + $0x38] sm:$0xff] }
 0x17e   : > { %v1884_v6 = vadd.f32 %v1854_v40, %v1662_v4  ;;  %1647 = vst.msk [vmem:[#allocation2 + $0x40] sm:$0xff] %vm358_vm4, %v1631_v2  ;;  %v1283_v4 = vld [vmem:[#allocation2 + $0x68] sm:$0xff] }
 0x17f   : > { %v2441_v5 = vpack.c.bf16 %v2152_v56, %v2152_v56  ;;  %v1605_v10 = vpop.f32.mrf.mxu2 }
 0x180   : > { %1900 = vst.msk [vmem:[#allocation2 + $0x38] sm:$0xff] %vm358_vm4, %v1884_v6  ;;  %v1915_v7 = vld [vmem:[#allocation2 + $0x30] sm:$0xff]  ;;  %v1859_v22 = vpop.f32.mrf.mxu3 }
 0x181   : > { %v2492_v11 = vshrl.u32 %v2441_v5, 16  ;;  %v2086_v8 = vadd.f32 %v2055_v32, %v1915_v7  ;;  %v1426_v13 = vpop.f32.mrf.mxu1  ;;  %v2495_v23 = vshll.u32 %v2441_v5, 16 }
 0x182   : > { %v1451_v17 = vadd.f32 %v1426_v13, %v1280_v62  ;;  %v2065_v58 = vpop.f32.mrf.mxu0 }
 0x183   : > { %v2494_v9 = vrot.slane %v2492_v11, 7  ;;  %2102 = vst.msk [vmem:[#allocation2 + $0x30] sm:$0xff] %vm358_vm4, %v2086_v8  ;;  %v1482_v3 = vld [vmem:[#allocation2 + $0x48] sm:$0xff] }
 0x184   : > { %v1632_v25 = vadd.f32 %v1605_v10, %v1482_v3  ;;  %1467 = vst.msk [vmem:[#allocation2 + $0x50] sm:$0xff] %vm358_vm4, %v1451_v17 }
 0x185   : > { %v2497_v15 = vor.u32 %v2495_v23, %v2494_v9  ;;  %v2499_v24 = vrot.slane %v2494_v9, 4  ;;  %v1663_v26 = vld [vmem:[#allocation2 + $0x40] sm:$0xff] }
 0x186   : > { %v1885_v21 = vadd.f32 %v1857_v57, %v1663_v26  ;;  %1648 = vst.msk [vmem:[#allocation2 + $0x48] sm:$0xff] %vm358_vm4, %v1632_v25  ;;  %v1284_v25 = vld [vmem:[#allocation2 + $0x70] sm:$0xff] }
 0x187   : > { %v2498_v27 = vsel %vm3852_vm12, %v3799_v14, %v2497_v15  ;;  %v2507_v18 = vsel %vm3852_vm12, %v2499_v24, %v3792_v12  ;;  %v1916_v30 = vld [vmem:[#allocation2 + $0x38] sm:$0xff]  ;;  %v1608_v33 = vpop.f32.mrf.mxu2 }
 0x188   : > { %2626 = vst.msk [vmem:[%s3785_s17 + $0x18] sm:$0xf] %vm2616_vm5, %v2498_v27  ;;  %v2087_v32 = vadd.f32 %v2057_v55, %v1916_v30  ;;  %v1862_v41 = vpop.f32.mrf.mxu3 }
 0x189   : > { %2627 = vst.msk [vmem:[%s3785_s17 + $0x1c] sm:$0xf] %vm2616_vm5, %v2507_v18  ;;  %v1428_v35 = vpop.f32.mrf.mxu1 }
 0x18a   : > { %v2119_v37 = vld [vmem:[#allocation2 + $0x30] sm:$0xff]  ;;  %1901 = vst.msk [vmem:[#allocation2 + $0x40] sm:$0xff] %vm358_vm4, %v1885_v21  ;;  %v1452_v38 = vadd.f32 %v1428_v35, %v1281_v34  ;;  %v2067_v17 = vpop.f32.mrf.mxu0 }
 0x18b   : > { %v2138_v39 = vadd.f32 %v3838_v31, %v2119_v37  ;;  %2103 = vst.msk [vmem:[#allocation2 + $0x38] sm:$0xff] %vm358_vm4, %v2087_v32  ;;  %v1483_v28 = vld [vmem:[#allocation2 + $0x50] sm:$0xff] }
 0x18c   : > { %v1633_v40 = vadd.f32 %v1608_v33, %v1483_v28  ;;  %1468 = vst.msk [vmem:[#allocation2 + $0x58] sm:$0xff] %vm358_vm4, %v1452_v38 }
 0x18d   : > { %v2154_v44 = vmax.f32 %v2138_v39, 0.0  ;;  %v1664_v29 = vld [vmem:[#allocation2 + $0x48] sm:$0xff] }
 0x18e   : > { %v1886_v45 = vadd.f32 %v1859_v22, %v1664_v29  ;;  %1649 = vst.msk [vmem:[#allocation2 + $0x50] sm:$0xff] %vm358_vm4, %v1633_v40 }
 0x18f   : > { %v2443_v49 = vpack.c.bf16 %v2154_v44, %v2154_v44  ;;  %v1610_v42 = vpop.f32.mrf.mxu2 }
 0x190   : > { %1902 = vst.msk [vmem:[#allocation2 + $0x48] sm:$0xff] %vm358_vm4, %v1886_v45  ;;  %v1864_v61 = vpop.f32.mrf.mxu3 }
 0x191   : > { %v2510_v19 = vshrl.u32 %v2443_v49, 16  ;;  %v1917_v50 = vld [vmem:[#allocation2 + $0x40] sm:$0xff]  ;;  %v1431_v48 = vpop.f32.mrf.mxu1  ;;  %v2513_v53 = vshll.u32 %v2443_v49, 16 }
 0x192   : > { %v2088_v43 = vadd.f32 %v2060_v16, %v1917_v50  ;;  %v1453_v51 = vadd.f32 %v1431_v48, %v1282_v36  ;;  %v2070_v40 = vpop.f32.mrf.mxu0 }
 0x193   : > { %v2512_v52 = vrot.slane %v2510_v19, 7  ;;  %v1484_v54 = vld [vmem:[#allocation2 + $0x58] sm:$0xff] }
 0x194   : > { %2104 = vst.msk [vmem:[#allocation2 + $0x40] sm:$0xff] %vm358_vm4, %v2088_v43  ;;  %v1634_v55 = vadd.f32 %v1610_v42, %v1484_v54 }
 0x195   : > { %v2515_v47 = vor.u32 %v2513_v53, %v2512_v52  ;;  %v2517_v57 = vrot.slane %v2512_v52, 4  ;;  %v1665_v59 = vld [vmem:[#allocation2 + $0x50] sm:$0xff]  ;;  %1469 = vst.msk [vmem:[#allocation2 + $0x60] sm:$0xff] %vm358_vm4, %v1453_v51 }
 0x196   : > { %v1887_v60 = vadd.f32 %v1862_v41, %v1665_v59  ;;  %1650 = vst.msk [vmem:[#allocation2 + $0x58] sm:$0xff] %vm358_vm4, %v1634_v55  ;;  %v1285_v41 = vld [vmem:[#allocation2 + $0x78] sm:$0xff] }
 0x197   : > { %v2516_v63 = vsel %vm3852_vm12, %v3799_v14, %v2515_v47  ;;  %v2525_v0 = vsel %vm3852_vm12, %v2517_v57, %v3792_v12  ;;  %v1918_v1 = vld [vmem:[#allocation2 + $0x48] sm:$0xff]  ;;  %v1613_v2 = vpop.f32.mrf.mxu2 }
 0x198   : > { %2628 = vst.msk [vmem:[%s3785_s17 + $0x20] sm:$0xf] %vm2616_vm5, %v2516_v63  ;;  %v2089_v56 = vadd.f32 %v2062_v20, %v1918_v1  ;;  %v1867_v9 = vpop.f32.mrf.mxu3 }
 0x199   : > { %2629 = vst.msk [vmem:[%s3785_s17 + $0x24] sm:$0xf] %vm2616_vm5, %v2525_v0  ;;  %v1433_v6 = vpop.f32.mrf.mxu1 }
 0x19a   : > { %1903 = vst.msk [vmem:[#allocation2 + $0x50] sm:$0xff] %vm358_vm4, %v1887_v60  ;;  %v1454_v5 = vadd.f32 %v1433_v6, %v1283_v4  ;;  %v2072_v47 = vpop.f32.mrf.mxu0 }
 0x19b   : > { %v2121_v10 = vld [vmem:[#allocation2 + $0x40] sm:$0xff]  ;;  %2105 = vst.msk [vmem:[#allocation2 + $0x48] sm:$0xff] %vm358_vm4, %v2089_v56 }
 0x19c   : > { %v2140_v7 = vadd.f32 %v3838_v31, %v2121_v10  ;;  %v1485_v11 = vld [vmem:[#allocation2 + $0x60] sm:$0xff]  ;;  %1470 = vst.msk [vmem:[#allocation2 + $0x68] sm:$0xff] %vm358_vm4, %v1454_v5 }
 0x19d   : > { %v1666_v8 = vld [vmem:[#allocation2 + $0x58] sm:$0xff]  ;;  %v1635_v62 = vadd.f32 %v1613_v2, %v1485_v11 }
 0x19e   : > { %v2156_v13 = vmax.f32 %v2140_v7, 0.0  ;;  %v1888_v16 = vadd.f32 %v1864_v61, %v1666_v8 }
 0x19f   : > { %1651 = vst.msk [vmem:[#allocation2 + $0x60] sm:$0xff] %vm358_vm4, %v1635_v62  ;;  %v1615_v23 = vpop.f32.mrf.mxu2 }
 0x1a0   : > { %v2445_v22 = vpack.c.bf16 %v2156_v13, %v2156_v13  ;;  %1904 = vst.msk [vmem:[#allocation2 + $0x58] sm:$0xff] %vm358_vm4, %v1888_v16  ;;  %v1869_v29 = vpop.f32.mrf.mxu3 }
 0x1a1   : > { %v1919_v3 = vld [vmem:[#allocation2 + $0x50] sm:$0xff]  ;;  %v1436_v15 = vpop.f32.mrf.mxu1 }
 0x1a2   : > { %v2528_v24 = vshrl.u32 %v2445_v22, 16  ;;  %v2090_v26 = vadd.f32 %v2065_v58, %v1919_v3  ;;  %v1455_v21 = vadd.f32 %v1436_v15, %v1284_v25  ;;  %v2531_v30 = vshll.u32 %v2445_v22, 16  ;;  %v2075_v13 = vpop.f32.mrf.mxu0 }
 0x1a3   : > { %v1486_v27 = vld [vmem:[#allocation2 + $0x68] sm:$0xff] }
 0x1a4   : > { %v2530_v18 = vrot.slane %v2528_v24, 7  ;;  %2106 = vst.msk [vmem:[#allocation2 + $0x50] sm:$0xff] %vm358_vm4, %v2090_v26  ;;  %v1636_v33 = vadd.f32 %v1615_v23, %v1486_v27 }
 0x1a5   : > { %1471 = vst.msk [vmem:[#allocation2 + $0x70] sm:$0xff] %vm358_vm4, %v1455_v21 }
 0x1a6   : > { %v2533_v32 = vor.u32 %v2531_v30, %v2530_v18  ;;  %v2535_v34 = vrot.slane %v2530_v18, 4  ;;  %v1667_v35 = vld [vmem:[#allocation2 + $0x60] sm:$0xff]  ;;  %1652 = vst.msk [vmem:[#allocation2 + $0x68] sm:$0xff] %vm358_vm4, %v1636_v33 }
 0x1a7   : > { %v1889_v37 = vadd.f32 %v1867_v9, %v1667_v35  ;;  %v1920_v38 = vld [vmem:[#allocation2 + $0x58] sm:$0xff]  ;;  %v1618_v45 = vpop.f32.mrf.mxu2 }
 0x1a8   : > { %v2534_v39 = vsel %vm3852_vm12, %v3799_v14, %v2533_v32  ;;  %v2543_v28 = vsel %vm3852_vm12, %v2535_v34, %v3792_v12  ;;  %v2091_v20 = vadd.f32 %v2067_v17, %v1920_v38  ;;  %v1872_v58 = vpop.f32.mrf.mxu3 }
 0x1a9   : > { %2630 = vst.msk [vmem:[%s3785_s17 + $0x28] sm:$0xf] %vm2616_vm5, %v2534_v39  ;;  %v1438_v44 = vpop.f32.mrf.mxu1 }
 0x1aa   : > { %2631 = vst.msk [vmem:[%s3785_s17 + $0x2c] sm:$0xf] %vm2616_vm5, %v2543_v28  ;;  %v1456_v49 = vadd.f32 %v1438_v44, %v1285_v41  ;;  %v2077_v27 = vpop.f32.mrf.mxu0 }
 0x1ab   : > { %v2123_v42 = vld [vmem:[#allocation2 + $0x50] sm:$0xff]  ;;  %1905 = vst.msk [vmem:[#allocation2 + $0x60] sm:$0xff] %vm358_vm4, %v1889_v37 }
 0x1ac   : > { %v2142_v19 = vadd.f32 %v3838_v31, %v2123_v42  ;;  %2107 = vst.msk [vmem:[#allocation2 + $0x58] sm:$0xff] %vm358_vm4, %v2091_v20  ;;  %v1487_v50 = vld [vmem:[#allocation2 + $0x70] sm:$0xff] }
 0x1ad   : > { %v1668_v36 = vld [vmem:[#allocation2 + $0x68] sm:$0xff]  ;;  %v1637_v48 = vadd.f32 %v1618_v45, %v1487_v50  ;;  %1472 = vst.msk [vmem:[#allocation2 + $0x78] sm:$0xff] %vm358_vm4, %v1456_v49 }
 0x1ae   : > { %v2158_v43 = vmax.f32 %v2142_v19, 0.0  ;;  %v1890_v51 = vadd.f32 %v1869_v29, %v1668_v36 }
 0x1af   : > { %1653 = vst.msk [vmem:[#allocation2 + $0x70] sm:$0xff] %vm358_vm4, %v1637_v48  ;;  %v1620_v61 = vpop.f32.mrf.mxu2 }
 0x1b0   : > { %v2447_v52 = vpack.c.bf16 %v2158_v43, %v2158_v43  ;;  %1906 = vst.msk [vmem:[#allocation2 + $0x68] sm:$0xff] %vm358_vm4, %v1890_v51  ;;  %v1874_v62 = vpop.f32.mrf.mxu3 }
 0x1b2   : > { %v2546_v53 = vshrl.u32 %v2447_v52, 16  ;;  %v1921_v54 = vld [vmem:[#allocation2 + $0x60] sm:$0xff]  ;;  %v2549_v59 = vshll.u32 %v2447_v52, 16 }
 0x1b3   : > { %v2092_v55 = vadd.f32 %v2070_v40, %v1921_v54 }
 0x1b4   : > { %v2548_v57 = vrot.slane %v2546_v53, 7  ;;  %v1488_v60 = vld [vmem:[#allocation2 + $0x78] sm:$0xff] }
 0x1b5   : > { %2108 = vst.msk [vmem:[#allocation2 + $0x60] sm:$0xff] %vm358_vm4, %v2092_v55  ;;  %v1638_v63 = vadd.f32 %v1620_v61, %v1488_v60 }
 0x1b6   : > { %v2551_v0 = vor.u32 %v2549_v59, %v2548_v57  ;;  %v2553_v1 = vrot.slane %v2548_v57, 4  ;;  %v1669_v2 = vld [vmem:[#allocation2 + $0x70] sm:$0xff] }
 0x1b7   : > { %v1891_v56 = vadd.f32 %v1872_v58, %v1669_v2  ;;  %1654 = vst.msk [vmem:[#allocation2 + $0x78] sm:$0xff] %vm358_vm4, %v1638_v63  ;;  %v1922_v4 = vld [vmem:[#allocation2 + $0x68] sm:$0xff] }
 0x1b8   : > { %v2552_v6 = vsel %vm3852_vm12, %v3799_v14, %v2551_v0  ;;  %v2561_v5 = vsel %vm3852_vm12, %v2553_v1, %v3792_v12  ;;  %v2093_v10 = vadd.f32 %v2072_v47, %v1922_v4 }
 0x1b9   : > { %2632 = vst.msk [vmem:[%s3785_s17 + $0x30] sm:$0xf] %vm2616_vm5, %v2552_v6 }
 0x1ba   : > { %2633 = vst.msk [vmem:[%s3785_s17 + $0x34] sm:$0xf] %vm2616_vm5, %v2561_v5 }
 0x1bb   : > { %1907 = vst.msk [vmem:[#allocation2 + $0x70] sm:$0xff] %vm358_vm4, %v1891_v56 }
 0x1bc   : > { %v2125_v7 = vld [vmem:[#allocation2 + $0x60] sm:$0xff]  ;;  %2109 = vst.msk [vmem:[#allocation2 + $0x68] sm:$0xff] %vm358_vm4, %v2093_v10 }
 0x1bd   : > { %v2144_v11 = vadd.f32 %v3838_v31, %v2125_v7 }
 0x1be   : > { %v1670_v8 = vld [vmem:[#allocation2 + $0x78] sm:$0xff] }
 0x1bf   : > { %v2160_v16 = vmax.f32 %v2144_v11, 0.0  ;;  %v1892_v17 = vadd.f32 %v1874_v62, %v1670_v8 }
 0x1c1   : > { %v2449_v22 = vpack.c.bf16 %v2160_v16, %v2160_v16  ;;  %1908 = vst.msk [vmem:[#allocation2 + $0x78] sm:$0xff] %vm358_vm4, %v1892_v17 }
 0x1c2   : > { %v1923_v9 = vld [vmem:[#allocation2 + $0x70] sm:$0xff] }
 0x1c3   : > { %v2564_v23 = vshrl.u32 %v2449_v22, 16  ;;  %v2094_v3 = vadd.f32 %v2075_v13, %v1923_v9  ;;  %v2567_v15 = vshll.u32 %v2449_v22, 16 }
 0x1c5   : > { %v2566_v25 = vrot.slane %v2564_v23, 7  ;;  %2110 = vst.msk [vmem:[#allocation2 + $0x70] sm:$0xff] %vm358_vm4, %v2094_v3 }
 0x1c7   : > { %v2569_v24 = vor.u32 %v2567_v15, %v2566_v25  ;;  %v2571_v26 = vrot.slane %v2566_v25, 4 }
 0x1c8   : > { %v1924_v21 = vld [vmem:[#allocation2 + $0x78] sm:$0xff] }
 0x1c9   : > { %v2570_v18 = vsel %vm3852_vm12, %v3799_v14, %v2569_v24  ;;  %v2579_v30 = vsel %vm3852_vm12, %v2571_v26, %v3792_v12  ;;  %v2095_v33 = vadd.f32 %v2077_v27, %v1924_v21 }
 0x1ca   : > { %2634 = vst.msk [vmem:[%s3785_s17 + $0x38] sm:$0xf] %vm2616_vm5, %v2570_v18 }
 0x1cb   : > { %2635 = vst.msk [vmem:[%s3785_s17 + $0x3c] sm:$0xf] %vm2616_vm5, %v2579_v30 }
 0x1cc   : > { %v2127_v32 = vld [vmem:[#allocation2 + $0x70] sm:$0xff]  ;;  %2111 = vst.msk [vmem:[#allocation2 + $0x78] sm:$0xff] %vm358_vm4, %v2095_v33 }
 0x1cd   : > { %v2146_v34 = vadd.f32 %v3838_v31, %v2127_v32 }
 0x1cf   : > { %v2162_v35 = vmax.f32 %v2146_v34, 0.0 }
 0x1d1   : > { %v2451_v37 = vpack.c.bf16 %v2162_v35, %v2162_v35 }
 0x1d3   : > { %v2582_v38 = vshrl.u32 %v2451_v37, 16  ;;  %v2585_v28 = vshll.u32 %v2451_v37, 16 }
 0x1d5   : > { %v2584_v39 = vrot.slane %v2582_v38, 7 }
 0x1d7   : > { %v2587_v20 = vor.u32 %v2585_v28, %v2584_v39  ;;  %v2589_v40 = vrot.slane %v2584_v39, 4 }
 0x1d9   : > { %v2588_v41 = vsel %vm3852_vm12, %v3799_v14, %v2587_v20  ;;  %v2597_v44 = vsel %vm3852_vm12, %v2589_v40, %v3792_v12 }
 0x1da   : > { %2636 = vst.msk [vmem:[%s3785_s17 + $0x40] sm:$0xf] %vm2616_vm5, %v2588_v41 }
 0x1db   : > { %2637 = vst.msk [vmem:[%s3785_s17 + $0x44] sm:$0xf] %vm2616_vm5, %v2597_v44 }
 0x1dc PF: > { %s13_s14 = sadd.s32 1, %s3262_s14   ;;  %s4017_s12 = smov %s3258_s13 }
 0x1dd   : > { %p10_p5 = scmp.ge.s32.totalorder %s13_s14, 4   ;;  %s4018_s13 = smov %s4020_s15 }
 0x1df   :  { %12 = sbr.rel (!%p10_p5) target bundleno = 2 (0x2), region = 76 }

</bundles_post_ra>
